<compile_context>
chip_gen: v5e
topology: v5e:2x2
jax: 0.10.0
libtpu: 0.0.40
codegen_flags: <defaults>
</compile_context>

<pallas_src>
from functools import partial

import jax
import jax.numpy as jnp
from jax import lax
from jax.experimental import pallas as pl
from jax.experimental.pallas import tpu as pltpu

LATENT_DIM = 4
OBS_DIM = 6
HIDDEN = 32
HIDDEN_LAYERS = 2   # kernel below is written/unrolled for exactly 2 layers
B = 2
T = 8


def decoder_kernel(x_ref, w0_ref, rec01_ref, rec1_ref, head_ref, bias_ref,
                   out_ref, *, seq_len, bp):
    """All refs are whole-array VMEM blocks.

    x_ref:     (T*bp, in_w)   time-major, batch padded to bp=8, col Din == 1.0
    w0_ref:    (in_w, 3H)     rows 0:Din = W_ih0^T, row Din = merged bias
                              [b_ir0+b_hr0, b_iz0+b_hz0, b_in0], rest zero
    rec01_ref: (H, 6H)        [W_hh0^T | W_ih1^T]
    rec1_ref:  (H, 3H)        W_hh1^T
    head_ref:  (2H, H)        rows 0:H = h1.W^T (zero-padded cols),
                              rows H:H+(H-5) = h2.W^T (zero-padded cols)
    bias_ref:  (1, 6H+obs)    [b_hn0 | b_rz1(merged) | b_in1 | b_hn1 | h1.b | h2.b]
    out_ref:   (T*bp, obs)
    """
    H = rec1_ref.shape[0]
    H2, H3 = 2 * H, 3 * H
    obs = out_ref.shape[1]

    # ---- One-time work, off the recurrence critical path. -------------------
    # Hoisted layer-0 input projection for ALL timesteps (biases folded in via
    # the ones column of x): one (T*bp, in_w) @ (in_w, 3H) matmul.
    gi0_all = jnp.dot(x_ref[...], w0_ref[...], preferred_element_type=jnp.float32)
    rec01 = rec01_ref[...]            # (H, 6H)
    rec1 = rec1_ref[...]              # (H, 3H)
    bhn0 = bias_ref[:, 0:H]           # (1, H)
    brz1 = bias_ref[:, H:H3]          # (1, 2H)  merged b_ir1+b_hr1 | b_iz1+b_hz1
    bin1 = bias_ref[:, H3:4 * H]      # (1, H)
    bhn1 = bias_ref[:, 4 * H:5 * H]   # (1, H)

    # ---- Skewed 2-layer GRU recurrence (static unroll, T small). ------------
    # Super-step 0: layer-0 step 0 only (h0 starts at zero -> no hidden matmul).
    gi0_t = gi0_all[0:bp, :]
    rz0 = jax.nn.sigmoid(gi0_t[:, :H2])
    n0 = jnp.tanh(gi0_t[:, H2:] + rz0[:, :H] * bhn0)
    h0 = (1.0 - rz0[:, H:]) * n0
    h1 = jnp.zeros((bp, H), jnp.float32)

    ys = []
    for t in range(1, seq_len + 1):
        # Both matmuls use the PRE-update h0/h1 -> two independent chains.
        g01 = jnp.dot(h0, rec01, preferred_element_type=jnp.float32)  # [gh0 | gi1]
        gh1 = jnp.dot(h1, rec1, preferred_element_type=jnp.float32)   # (bp, 3H)

        # Layer 1, step t-1 (input = layer-0 output at time t-1 = current h0).
        gi1 = g01[:, H3:]
        rz1 = jax.nn.sigmoid(gi1[:, :H2] + gh1[:, :H2] + brz1)
        n1 = jnp.tanh(gi1[:, H2:] + bin1 + rz1[:, :H] * (gh1[:, H2:] + bhn1))
        h1 = (1.0 - rz1[:, H:]) * n1 + rz1[:, H:] * h1
        ys.append(h1)

        # Layer 0, step t.
        if t < seq_len:
            gi0_t = gi0_all[t * bp:(t + 1) * bp, :]
            gh0 = g01[:, :H3]
            rz0 = jax.nn.sigmoid(gi0_t[:, :H2] + gh0[:, :H2])
            n0 = jnp.tanh(gi0_t[:, H2:] + rz0[:, :H] * (gh0[:, H2:] + bhn0))
            h0 = (1.0 - rz0[:, H:]) * n0 + rz0[:, H:] * h0

    # ---- Head on the whole sequence: two matmuls and a single store. --------
    seq1 = jnp.concatenate(ys, axis=0)                    # (T*bp, H)
    y = jnp.tanh(jnp.dot(seq1, head_ref[0:H, :], preferred_element_type=jnp.float32)
                 + bias_ref[:, 5 * H:6 * H])              # padded cols stay 0
    out_ref[...] = (jnp.dot(y, head_ref[H:2 * H, 0:obs],
                            preferred_element_type=jnp.float32)
                    + bias_ref[:, 6 * H:6 * H + obs])


def make_decoder(params, *, batch=B, seq_len=T):
    """One-time parameter packing; returns a jitted forward(x) callable."""
    f32 = jnp.float32
    H = params['whh0'].shape[1]
    Din = params['wih0'].shape[1]
    obs = params['h2w'].shape[0]
    Hm5 = params['h1w'].shape[0]
    BP = 8                                     # padded batch = one sublane tile
    in_w = max(8, -(-(Din + 1) // 8) * 8)      # x cols: [x | 1 | 0-pad]

    # Layer-0 input projection slab: W_ih0^T plus merged-bias row (ones-column).
    bias0 = params['bih0'] + jnp.concatenate(
        [params['bhh0'][:2 * H], jnp.zeros((H,), f32)])
    w0 = jnp.zeros((in_w, 3 * H), f32)
    w0 = w0.at[:Din, :].set(params['wih0'].T).at[Din, :].set(bias0)

    # Recurrent slabs: gh0|gi1 share lhs h0 -> fuse their RHS into one slab.
    rec01 = jnp.concatenate([params['whh0'].T, params['wih1'].T], axis=1)  # (H, 6H)
    rec1 = params['whh1'].T                                                # (H, 3H)

    # Head slab (zero-padded so all contraction dims are full 32-wide).
    head = jnp.zeros((2 * H, H), f32)
    head = head.at[:H, :Hm5].set(params['h1w'].T)
    head = head.at[H:H + Hm5, :obs].set(params['h2w'].T)

    # All remaining biases in one row vector.
    bias = jnp.zeros((1, 6 * H + obs), f32)
    bias = bias.at[0, 0:H].set(params['bhh0'][2 * H:])
    bias = bias.at[0, H:3 * H].set(params['bih1'][:2 * H] + params['bhh1'][:2 * H])
    bias = bias.at[0, 3 * H:4 * H].set(params['bih1'][2 * H:])
    bias = bias.at[0, 4 * H:5 * H].set(params['bhh1'][2 * H:])
    bias = bias.at[0, 5 * H:5 * H + Hm5].set(params['h1b'])
    bias = bias.at[0, 6 * H:6 * H + obs].set(params['h2b'])

    vmem = pl.BlockSpec(memory_space=pltpu.MemorySpace.VMEM)
    call = pl.pallas_call(
        partial(decoder_kernel, seq_len=seq_len, bp=BP),
        out_shape=jax.ShapeDtypeStruct((seq_len * BP, obs), f32),
        in_specs=[vmem] * 6,
        out_specs=vmem,
    )

    @jax.jit
    def forward(x):
        # x: (batch, seq_len, Din), batch_first like the PyTorch module.
        xt = jnp.transpose(x, (1, 0, 2))                      # (T, B, Din)
        x_aug = jnp.zeros((seq_len, BP, in_w), f32)
        x_aug = x_aug.at[:, :batch, :Din].set(xt)
        x_aug = x_aug.at[:, :, Din].set(1.0)                  # ones column (bias fold)
        x_aug = x_aug.reshape(seq_len * BP, in_w)
        out = call(x_aug, w0, rec01, rec1, head, bias)        # (T*BP, obs)
        out = out.reshape(seq_len, BP, obs)[:, :batch, :]     # drop pad rows
        return jnp.transpose(out, (1, 0, 2))                  # (B, T, obs)

    return forward


def decoder_ref(x, params):
    """Pure-JAX reference matching torch.nn.GRU + Linear + Tanh + Linear."""
    Bx, _, _ = x.shape
    H = HIDDEN

    def gru_layer(xs, wih, whh, bih, bhh):
        def step(h, x_t):
            gi = x_t @ wih.T + bih
            gh = h @ whh.T + bhh
            r = jax.nn.sigmoid(gi[:, :H] + gh[:, :H])
            z = jax.nn.sigmoid(gi[:, H:2 * H] + gh[:, H:2 * H])
            n = jnp.tanh(gi[:, 2 * H:] + r * gh[:, 2 * H:])
            h_new = (1.0 - z) * n + z * h
            return h_new, h_new
        _, ys = lax.scan(step, jnp.zeros((Bx, H), jnp.float32),
                         jnp.transpose(xs, (1, 0, 2)))
        return jnp.transpose(ys, (1, 0, 2))

    y = gru_layer(x, params['wih0'], params['whh0'], params['bih0'], params['bhh0'])
    y = gru_layer(y, params['wih1'], params['whh1'], params['bih1'], params['bhh1'])
    y = jnp.tanh(y @ params['h1w'].T + params['h1b'])
    y = y @ params['h2w'].T + params['h2b']
    return y


if __name__ == "__main__":
    key = jax.random.PRNGKey(0)
    keys = jax.random.split(key, 13)

    def u(kk, shape, bound):
        return jax.random.uniform(kk, shape, jnp.float32, -bound, bound)

    kg = 1.0 / float(HIDDEN) ** 0.5           # GRU / Linear(H, H-5) init bound
    kh2 = 1.0 / float(HIDDEN - 5) ** 0.5      # Linear(H-5, obs) init bound

    params = {
        # GRU layer 0: input size = LATENT_DIM
        'wih0': u(keys[0], (3 * HIDDEN, LATENT_DIM), kg),
        'whh0': u(keys[1], (3 * HIDDEN, HIDDEN), kg),
        'bih0': u(keys[2], (3 * HIDDEN,), kg),
        'bhh0': u(keys[3], (3 * HIDDEN,), kg),
        # GRU layer 1: input size = HIDDEN
        'wih1': u(keys[4], (3 * HIDDEN, HIDDEN), kg),
        'whh1': u(keys[5], (3 * HIDDEN, HIDDEN), kg),
        'bih1': u(keys[6], (3 * HIDDEN,), kg),
        'bhh1': u(keys[7], (3 * HIDDEN,), kg),
        # h1: Linear(HIDDEN, HIDDEN - 5)
        'h1w': u(keys[8], (HIDDEN - 5, HIDDEN), kg),
        'h1b': u(keys[9], (HIDDEN - 5,), kg),
        # h2: Linear(HIDDEN - 5, OBS_DIM)
        'h2w': u(keys[10], (OBS_DIM, HIDDEN - 5), kh2),
        'h2b': u(keys[11], (OBS_DIM,), kh2),
    }

    x = jax.random.normal(keys[12], (B, T, LATENT_DIM), jnp.float32)

    decoder_forward = make_decoder(params, batch=B, seq_len=T)
    out = jax.block_until_ready(decoder_forward(x))
    ref = decoder_ref(x, params)

    assert out.shape == (B, T, OBS_DIM), out.shape
    assert jnp.allclose(out, ref, atol=1e-3, rtol=1e-3), \
        float(jnp.max(jnp.abs(out - ref)))

    print("KERNEL_OK")
</pallas_src>

<mosaic_0001>
module attributes {stable_mosaic.version = 11 : i64} {
  func.func @decoder_kernel(%arg0: memref<64x8xf32, #tpu.memory_space<vmem>>, %arg1: memref<8x96xf32, #tpu.memory_space<vmem>>, %arg2: memref<32x192xf32, #tpu.memory_space<vmem>>, %arg3: memref<32x96xf32, #tpu.memory_space<vmem>>, %arg4: memref<64x32xf32, #tpu.memory_space<vmem>>, %arg5: memref<1x198xf32, #tpu.memory_space<vmem>>, %arg6: memref<64x6xf32, #tpu.memory_space<vmem>>) attributes {dimension_semantics = [], scalar_prefetch = 0 : i64, scratch_operands = 0 : i64, tpu.core_type = #tpu.core_type<tc>} {
    %c0 = arith.constant 0 : index
    %c0_0 = arith.constant 0 : index
    %0 = vector.load %arg0[%c0, %c0_0] : memref<64x8xf32, #tpu.memory_space<vmem>>, vector<64x8xf32>
    %c0_1 = arith.constant 0 : index
    %c0_2 = arith.constant 0 : index
    %1 = vector.load %arg1[%c0_1, %c0_2] : memref<8x96xf32, #tpu.memory_space<vmem>>, vector<8x96xf32>
    %cst = arith.constant dense<0.000000e+00> : vector<64x96xf32>
    %2 = tpu.matmul %0, %1, %cst {dimension_numbers = #tpu.dot_dimension_numbers<[1], [0], [0], [1], [0, 0, 1, 1], [], []>} : vector<64x8xf32>, vector<8x96xf32>, vector<64x96xf32> -> vector<64x96xf32>
    %c0_3 = arith.constant 0 : index
    %c0_4 = arith.constant 0 : index
    %3 = vector.load %arg2[%c0_3, %c0_4] : memref<32x192xf32, #tpu.memory_space<vmem>>, vector<32x192xf32>
    %c0_5 = arith.constant 0 : index
    %c0_6 = arith.constant 0 : index
    %4 = vector.load %arg3[%c0_5, %c0_6] : memref<32x96xf32, #tpu.memory_space<vmem>>, vector<32x96xf32>
    %c0_7 = arith.constant 0 : index
    %c0_8 = arith.constant 0 : index
    %5 = vector.load %arg5[%c0_7, %c0_8] : memref<1x198xf32, #tpu.memory_space<vmem>>, vector<1x32xf32>
    %c0_9 = arith.constant 0 : index
    %c32 = arith.constant 32 : index
    %6 = vector.load %arg5[%c0_9, %c32] : memref<1x198xf32, #tpu.memory_space<vmem>>, vector<1x64xf32>
    %c0_10 = arith.constant 0 : index
    %c96 = arith.constant 96 : index
    %7 = vector.load %arg5[%c0_10, %c96] : memref<1x198xf32, #tpu.memory_space<vmem>>, vector<1x32xf32>
    %c0_11 = arith.constant 0 : index
    %c128 = arith.constant 128 : index
    %8 = vector.load %arg5[%c0_11, %c128] : memref<1x198xf32, #tpu.memory_space<vmem>>, vector<1x32xf32>
    %9 = vector.extract_strided_slice %2 {offsets = [0, 0], sizes = [8, 96], strides = [1, 1]} : vector<64x96xf32> to vector<8x96xf32>
    %10 = vector.extract_strided_slice %9 {offsets = [0, 0], sizes = [8, 64], strides = [1, 1]} : vector<8x96xf32> to vector<8x64xf32>
    %11 = arith.negf %10 : vector<8x64xf32>
    %12 = math.exp %11 : vector<8x64xf32>
    %cst_12 = arith.constant 1.000000e+00 : f32
    %13 = vector.broadcast %cst_12 : f32 to vector<8x64xf32>
    %14 = arith.addf %13, %12 : vector<8x64xf32>
    %15 = arith.divf %13, %14 : vector<8x64xf32>
    %16 = vector.extract_strided_slice %9 {offsets = [0, 64], sizes = [8, 32], strides = [1, 1]} : vector<8x96xf32> to vector<8x32xf32>
    %17 = vector.extract_strided_slice %15 {offsets = [0, 0], sizes = [8, 32], strides = [1, 1]} : vector<8x64xf32> to vector<8x32xf32>
    %18 = vector.broadcast %5 : vector<1x32xf32> to vector<8x32xf32>
    %19 = arith.mulf %17, %18 : vector<8x32xf32>
    %20 = arith.addf %16, %19 : vector<8x32xf32>
    %21 = math.tanh %20 : vector<8x32xf32>
    %22 = vector.extract_strided_slice %15 {offsets = [0, 32], sizes = [8, 32], strides = [1, 1]} : vector<8x64xf32> to vector<8x32xf32>
    %cst_13 = arith.constant 1.000000e+00 : f32
    %23 = vector.broadcast %cst_13 : f32 to vector<8x32xf32>
    %24 = arith.subf %23, %22 : vector<8x32xf32>
    %25 = arith.mulf %24, %21 : vector<8x32xf32>
    %cst_14 = arith.constant 0.000000e+00 : f32
    %26 = vector.broadcast %cst_14 : f32 to vector<8x32xf32>
    %cst_15 = arith.constant dense<0.000000e+00> : vector<8x192xf32>
    %27 = tpu.matmul %25, %3, %cst_15 {dimension_numbers = #tpu.dot_dimension_numbers<[1], [0], [0], [1], [0, 0, 1, 1], [], []>} : vector<8x32xf32>, vector<32x192xf32>, vector<8x192xf32> -> vector<8x192xf32>
    %cst_16 = arith.constant dense<0.000000e+00> : vector<8x96xf32>
    %28 = tpu.matmul %26, %4, %cst_16 {dimension_numbers = #tpu.dot_dimension_numbers<[1], [0], [0], [1], [0, 0, 1, 1], [], []>} : vector<8x32xf32>, vector<32x96xf32>, vector<8x96xf32> -> vector<8x96xf32>
    %29 = vector.extract_strided_slice %27 {offsets = [0, 96], sizes = [8, 96], strides = [1, 1]} : vector<8x192xf32> to vector<8x96xf32>
    %30 = vector.extract_strided_slice %29 {offsets = [0, 0], sizes = [8, 64], strides = [1, 1]} : vector<8x96xf32> to vector<8x64xf32>
    %31 = vector.extract_strided_slice %28 {offsets = [0, 0], sizes = [8, 64], strides = [1, 1]} : vector<8x96xf32> to vector<8x64xf32>
    %32 = arith.addf %30, %31 : vector<8x64xf32>
    %33 = vector.broadcast %6 : vector<1x64xf32> to vector<8x64xf32>
    %34 = arith.addf %32, %33 : vector<8x64xf32>
    %35 = arith.negf %34 : vector<8x64xf32>
    %36 = math.exp %35 : vector<8x64xf32>
    %cst_17 = arith.constant 1.000000e+00 : f32
    %37 = vector.broadcast %cst_17 : f32 to vector<8x64xf32>
    %38 = arith.addf %37, %36 : vector<8x64xf32>
    %39 = arith.divf %37, %38 : vector<8x64xf32>
    %40 = vector.extract_strided_slice %29 {offsets = [0, 64], sizes = [8, 32], strides = [1, 1]} : vector<8x96xf32> to vector<8x32xf32>
    %41 = vector.broadcast %7 : vector<1x32xf32> to vector<8x32xf32>
    %42 = arith.addf %40, %41 : vector<8x32xf32>
    %43 = vector.extract_strided_slice %39 {offsets = [0, 0], sizes = [8, 32], strides = [1, 1]} : vector<8x64xf32> to vector<8x32xf32>
    %44 = vector.extract_strided_slice %28 {offsets = [0, 64], sizes = [8, 32], strides = [1, 1]} : vector<8x96xf32> to vector<8x32xf32>
    %45 = vector.broadcast %8 : vector<1x32xf32> to vector<8x32xf32>
    %46 = arith.addf %44, %45 : vector<8x32xf32>
    %47 = arith.mulf %43, %46 : vector<8x32xf32>
    %48 = arith.addf %42, %47 : vector<8x32xf32>
    %49 = math.tanh %48 : vector<8x32xf32>
    %50 = vector.extract_strided_slice %39 {offsets = [0, 32], sizes = [8, 32], strides = [1, 1]} : vector<8x64xf32> to vector<8x32xf32>
    %cst_18 = arith.constant 1.000000e+00 : f32
    %51 = vector.broadcast %cst_18 : f32 to vector<8x32xf32>
    %52 = arith.subf %51, %50 : vector<8x32xf32>
    %53 = arith.mulf %52, %49 : vector<8x32xf32>
    %54 = vector.extract_strided_slice %39 {offsets = [0, 32], sizes = [8, 32], strides = [1, 1]} : vector<8x64xf32> to vector<8x32xf32>
    %55 = arith.mulf %54, %26 : vector<8x32xf32>
    %56 = arith.addf %53, %55 : vector<8x32xf32>
    %57 = vector.extract_strided_slice %2 {offsets = [8, 0], sizes = [8, 96], strides = [1, 1]} : vector<64x96xf32> to vector<8x96xf32>
    %58 = vector.extract_strided_slice %27 {offsets = [0, 0], sizes = [8, 96], strides = [1, 1]} : vector<8x192xf32> to vector<8x96xf32>
    %59 = vector.extract_strided_slice %57 {offsets = [0, 0], sizes = [8, 64], strides = [1, 1]} : vector<8x96xf32> to vector<8x64xf32>
    %60 = vector.extract_strided_slice %58 {offsets = [0, 0], sizes = [8, 64], strides = [1, 1]} : vector<8x96xf32> to vector<8x64xf32>
    %61 = arith.addf %59, %60 : vector<8x64xf32>
    %62 = arith.negf %61 : vector<8x64xf32>
    %63 = math.exp %62 : vector<8x64xf32>
    %cst_19 = arith.constant 1.000000e+00 : f32
    %64 = vector.broadcast %cst_19 : f32 to vector<8x64xf32>
    %65 = arith.addf %64, %63 : vector<8x64xf32>
    %66 = arith.divf %64, %65 : vector<8x64xf32>
    %67 = vector.extract_strided_slice %57 {offsets = [0, 64], sizes = [8, 32], strides = [1, 1]} : vector<8x96xf32> to vector<8x32xf32>
    %68 = vector.extract_strided_slice %66 {offsets = [0, 0], sizes = [8, 32], strides = [1, 1]} : vector<8x64xf32> to vector<8x32xf32>
    %69 = vector.extract_strided_slice %58 {offsets = [0, 64], sizes = [8, 32], strides = [1, 1]} : vector<8x96xf32> to vector<8x32xf32>
    %70 = vector.broadcast %5 : vector<1x32xf32> to vector<8x32xf32>
    %71 = arith.addf %69, %70 : vector<8x32xf32>
    %72 = arith.mulf %68, %71 : vector<8x32xf32>
    %73 = arith.addf %67, %72 : vector<8x32xf32>
    %74 = math.tanh %73 : vector<8x32xf32>
    %75 = vector.extract_strided_slice %66 {offsets = [0, 32], sizes = [8, 32], strides = [1, 1]} : vector<8x64xf32> to vector<8x32xf32>
    %cst_20 = arith.constant 1.000000e+00 : f32
    %76 = vector.broadcast %cst_20 : f32 to vector<8x32xf32>
    %77 = arith.subf %76, %75 : vector<8x32xf32>
    %78 = arith.mulf %77, %74 : vector<8x32xf32>
    %79 = vector.extract_strided_slice %66 {offsets = [0, 32], sizes = [8, 32], strides = [1, 1]} : vector<8x64xf32> to vector<8x32xf32>
    %80 = arith.mulf %79, %25 : vector<8x32xf32>
    %81 = arith.addf %78, %80 : vector<8x32xf32>
    %cst_21 = arith.constant dense<0.000000e+00> : vector<8x192xf32>
    %82 = tpu.matmul %81, %3, %cst_21 {dimension_numbers = #tpu.dot_dimension_numbers<[1], [0], [0], [1], [0, 0, 1, 1], [], []>} : vector<8x32xf32>, vector<32x192xf32>, vector<8x192xf32> -> vector<8x192xf32>
    %cst_22 = arith.constant dense<0.000000e+00> : vector<8x96xf32>
    %83 = tpu.matmul %56, %4, %cst_22 {dimension_numbers = #tpu.dot_dimension_numbers<[1], [0], [0], [1], [0, 0, 1, 1], [], []>} : vector<8x32xf32>, vector<32x96xf32>, vector<8x96xf32> -> vector<8x96xf32>
    %84 = vector.extract_strided_slice %82 {offsets = [0, 96], sizes = [8, 96], strides = [1, 1]} : vector<8x192xf32> to vector<8x96xf32>
    %85 = vector.extract_strided_slice %84 {offsets = [0, 0], sizes = [8, 64], strides = [1, 1]} : vector<8x96xf32> to vector<8x64xf32>
    %86 = vector.extract_strided_slice %83 {offsets = [0, 0], sizes = [8, 64], strides = [1, 1]} : vector<8x96xf32> to vector<8x64xf32>
    %87 = arith.addf %85, %86 : vector<8x64xf32>
    %88 = vector.broadcast %6 : vector<1x64xf32> to vector<8x64xf32>
    %89 = arith.addf %87, %88 : vector<8x64xf32>
    %90 = arith.negf %89 : vector<8x64xf32>
    %91 = math.exp %90 : vector<8x64xf32>
    %cst_23 = arith.constant 1.000000e+00 : f32
    %92 = vector.broadcast %cst_23 : f32 to vector<8x64xf32>
    %93 = arith.addf %92, %91 : vector<8x64xf32>
    %94 = arith.divf %92, %93 : vector<8x64xf32>
    %95 = vector.extract_strided_slice %84 {offsets = [0, 64], sizes = [8, 32], strides = [1, 1]} : vector<8x96xf32> to vector<8x32xf32>
    %96 = vector.broadcast %7 : vector<1x32xf32> to vector<8x32xf32>
    %97 = arith.addf %95, %96 : vector<8x32xf32>
    %98 = vector.extract_strided_slice %94 {offsets = [0, 0], sizes = [8, 32], strides = [1, 1]} : vector<8x64xf32> to vector<8x32xf32>
    %99 = vector.extract_strided_slice %83 {offsets = [0, 64], sizes = [8, 32], strides = [1, 1]} : vector<8x96xf32> to vector<8x32xf32>
    %100 = vector.broadcast %8 : vector<1x32xf32> to vector<8x32xf32>
    %101 = arith.addf %99, %100 : vector<8x32xf32>
    %102 = arith.mulf %98, %101 : vector<8x32xf32>
    %103 = arith.addf %97, %102 : vector<8x32xf32>
    %104 = math.tanh %103 : vector<8x32xf32>
    %105 = vector.extract_strided_slice %94 {offsets = [0, 32], sizes = [8, 32], strides = [1, 1]} : vector<8x64xf32> to vector<8x32xf32>
    %cst_24 = arith.constant 1.000000e+00 : f32
    %106 = vector.broadcast %cst_24 : f32 to vector<8x32xf32>
    %107 = arith.subf %106, %105 : vector<8x32xf32>
    %108 = arith.mulf %107, %104 : vector<8x32xf32>
    %109 = vector.extract_strided_slice %94 {offsets = [0, 32], sizes = [8, 32], strides = [1, 1]} : vector<8x64xf32> to vector<8x32xf32>
    %110 = arith.mulf %109, %56 : vector<8x32xf32>
    %111 = arith.addf %108, %110 : vector<8x32xf32>
    %112 = vector.extract_strided_slice %2 {offsets = [16, 0], sizes = [8, 96], strides = [1, 1]} : vector<64x96xf32> to vector<8x96xf32>
    %113 = vector.extract_strided_slice %82 {offsets = [0, 0], sizes = [8, 96], strides = [1, 1]} : vector<8x192xf32> to vector<8x96xf32>
    %114 = vector.extract_strided_slice %112 {offsets = [0, 0], sizes = [8, 64], strides = [1, 1]} : vector<8x96xf32> to vector<8x64xf32>
    %115 = vector.extract_strided_slice %113 {offsets = [0, 0], sizes = [8, 64], strides = [1, 1]} : vector<8x96xf32> to vector<8x64xf32>
    %116 = arith.addf %114, %115 : vector<8x64xf32>
    %117 = arith.negf %116 : vector<8x64xf32>
    %118 = math.exp %117 : vector<8x64xf32>
    %cst_25 = arith.constant 1.000000e+00 : f32
    %119 = vector.broadcast %cst_25 : f32 to vector<8x64xf32>
    %120 = arith.addf %119, %118 : vector<8x64xf32>
    %121 = arith.divf %119, %120 : vector<8x64xf32>
    %122 = vector.extract_strided_slice %112 {offsets = [0, 64], sizes = [8, 32], strides = [1, 1]} : vector<8x96xf32> to vector<8x32xf32>
    %123 = vector.extract_strided_slice %121 {offsets = [0, 0], sizes = [8, 32], strides = [1, 1]} : vector<8x64xf32> to vector<8x32xf32>
    %124 = vector.extract_strided_slice %113 {offsets = [0, 64], sizes = [8, 32], strides = [1, 1]} : vector<8x96xf32> to vector<8x32xf32>
    %125 = vector.broadcast %5 : vector<1x32xf32> to vector<8x32xf32>
    %126 = arith.addf %124, %125 : vector<8x32xf32>
    %127 = arith.mulf %123, %126 : vector<8x32xf32>
    %128 = arith.addf %122, %127 : vector<8x32xf32>
    %129 = math.tanh %128 : vector<8x32xf32>
    %130 = vector.extract_strided_slice %121 {offsets = [0, 32], sizes = [8, 32], strides = [1, 1]} : vector<8x64xf32> to vector<8x32xf32>
    %cst_26 = arith.constant 1.000000e+00 : f32
    %131 = vector.broadcast %cst_26 : f32 to vector<8x32xf32>
    %132 = arith.subf %131, %130 : vector<8x32xf32>
    %133 = arith.mulf %132, %129 : vector<8x32xf32>
    %134 = vector.extract_strided_slice %121 {offsets = [0, 32], sizes = [8, 32], strides = [1, 1]} : vector<8x64xf32> to vector<8x32xf32>
    %135 = arith.mulf %134, %81 : vector<8x32xf32>
    %136 = arith.addf %133, %135 : vector<8x32xf32>
    %cst_27 = arith.constant dense<0.000000e+00> : vector<8x192xf32>
    %137 = tpu.matmul %136, %3, %cst_27 {dimension_numbers = #tpu.dot_dimension_numbers<[1], [0], [0], [1], [0, 0, 1, 1], [], []>} : vector<8x32xf32>, vector<32x192xf32>, vector<8x192xf32> -> vector<8x192xf32>
    %cst_28 = arith.constant dense<0.000000e+00> : vector<8x96xf32>
    %138 = tpu.matmul %111, %4, %cst_28 {dimension_numbers = #tpu.dot_dimension_numbers<[1], [0], [0], [1], [0, 0, 1, 1], [], []>} : vector<8x32xf32>, vector<32x96xf32>, vector<8x96xf32> -> vector<8x96xf32>
    %139 = vector.extract_strided_slice %137 {offsets = [0, 96], sizes = [8, 96], strides = [1, 1]} : vector<8x192xf32> to vector<8x96xf32>
    %140 = vector.extract_strided_slice %139 {offsets = [0, 0], sizes = [8, 64], strides = [1, 1]} : vector<8x96xf32> to vector<8x64xf32>
    %141 = vector.extract_strided_slice %138 {offsets = [0, 0], sizes = [8, 64], strides = [1, 1]} : vector<8x96xf32> to vector<8x64xf32>
    %142 = arith.addf %140, %141 : vector<8x64xf32>
    %143 = vector.broadcast %6 : vector<1x64xf32> to vector<8x64xf32>
    %144 = arith.addf %142, %143 : vector<8x64xf32>
    %145 = arith.negf %144 : vector<8x64xf32>
    %146 = math.exp %145 : vector<8x64xf32>
    %cst_29 = arith.constant 1.000000e+00 : f32
    %147 = vector.broadcast %cst_29 : f32 to vector<8x64xf32>
    %148 = arith.addf %147, %146 : vector<8x64xf32>
    %149 = arith.divf %147, %148 : vector<8x64xf32>
    %150 = vector.extract_strided_slice %139 {offsets = [0, 64], sizes = [8, 32], strides = [1, 1]} : vector<8x96xf32> to vector<8x32xf32>
    %151 = vector.broadcast %7 : vector<1x32xf32> to vector<8x32xf32>
    %152 = arith.addf %150, %151 : vector<8x32xf32>
    %153 = vector.extract_strided_slice %149 {offsets = [0, 0], sizes = [8, 32], strides = [1, 1]} : vector<8x64xf32> to vector<8x32xf32>
    %154 = vector.extract_strided_slice %138 {offsets = [0, 64], sizes = [8, 32], strides = [1, 1]} : vector<8x96xf32> to vector<8x32xf32>
    %155 = vector.broadcast %8 : vector<1x32xf32> to vector<8x32xf32>
    %156 = arith.addf %154, %155 : vector<8x32xf32>
    %157 = arith.mulf %153, %156 : vector<8x32xf32>
    %158 = arith.addf %152, %157 : vector<8x32xf32>
    %159 = math.tanh %158 : vector<8x32xf32>
    %160 = vector.extract_strided_slice %149 {offsets = [0, 32], sizes = [8, 32], strides = [1, 1]} : vector<8x64xf32> to vector<8x32xf32>
    %cst_30 = arith.constant 1.000000e+00 : f32
    %161 = vector.broadcast %cst_30 : f32 to vector<8x32xf32>
    %162 = arith.subf %161, %160 : vector<8x32xf32>
    %163 = arith.mulf %162, %159 : vector<8x32xf32>
    %164 = vector.extract_strided_slice %149 {offsets = [0, 32], sizes = [8, 32], strides = [1, 1]} : vector<8x64xf32> to vector<8x32xf32>
    %165 = arith.mulf %164, %111 : vector<8x32xf32>
    %166 = arith.addf %163, %165 : vector<8x32xf32>
    %167 = vector.extract_strided_slice %2 {offsets = [24, 0], sizes = [8, 96], strides = [1, 1]} : vector<64x96xf32> to vector<8x96xf32>
    %168 = vector.extract_strided_slice %137 {offsets = [0, 0], sizes = [8, 96], strides = [1, 1]} : vector<8x192xf32> to vector<8x96xf32>
    %169 = vector.extract_strided_slice %167 {offsets = [0, 0], sizes = [8, 64], strides = [1, 1]} : vector<8x96xf32> to vector<8x64xf32>
    %170 = vector.extract_strided_slice %168 {offsets = [0, 0], sizes = [8, 64], strides = [1, 1]} : vector<8x96xf32> to vector<8x64xf32>
    %171 = arith.addf %169, %170 : vector<8x64xf32>
    %172 = arith.negf %171 : vector<8x64xf32>
    %173 = math.exp %172 : vector<8x64xf32>
    %cst_31 = arith.constant 1.000000e+00 : f32
    %174 = vector.broadcast %cst_31 : f32 to vector<8x64xf32>
    %175 = arith.addf %174, %173 : vector<8x64xf32>
    %176 = arith.divf %174, %175 : vector<8x64xf32>
    %177 = vector.extract_strided_slice %167 {offsets = [0, 64], sizes = [8, 32], strides = [1, 1]} : vector<8x96xf32> to vector<8x32xf32>
    %178 = vector.extract_strided_slice %176 {offsets = [0, 0], sizes = [8, 32], strides = [1, 1]} : vector<8x64xf32> to vector<8x32xf32>
    %179 = vector.extract_strided_slice %168 {offsets = [0, 64], sizes = [8, 32], strides = [1, 1]} : vector<8x96xf32> to vector<8x32xf32>
    %180 = vector.broadcast %5 : vector<1x32xf32> to vector<8x32xf32>
    %181 = arith.addf %179, %180 : vector<8x32xf32>
    %182 = arith.mulf %178, %181 : vector<8x32xf32>
    %183 = arith.addf %177, %182 : vector<8x32xf32>
    %184 = math.tanh %183 : vector<8x32xf32>
    %185 = vector.extract_strided_slice %176 {offsets = [0, 32], sizes = [8, 32], strides = [1, 1]} : vector<8x64xf32> to vector<8x32xf32>
    %cst_32 = arith.constant 1.000000e+00 : f32
    %186 = vector.broadcast %cst_32 : f32 to vector<8x32xf32>
    %187 = arith.subf %186, %185 : vector<8x32xf32>
    %188 = arith.mulf %187, %184 : vector<8x32xf32>
    %189 = vector.extract_strided_slice %176 {offsets = [0, 32], sizes = [8, 32], strides = [1, 1]} : vector<8x64xf32> to vector<8x32xf32>
    %190 = arith.mulf %189, %136 : vector<8x32xf32>
    %191 = arith.addf %188, %190 : vector<8x32xf32>
    %cst_33 = arith.constant dense<0.000000e+00> : vector<8x192xf32>
    %192 = tpu.matmul %191, %3, %cst_33 {dimension_numbers = #tpu.dot_dimension_numbers<[1], [0], [0], [1], [0, 0, 1, 1], [], []>} : vector<8x32xf32>, vector<32x192xf32>, vector<8x192xf32> -> vector<8x192xf32>
    %cst_34 = arith.constant dense<0.000000e+00> : vector<8x96xf32>
    %193 = tpu.matmul %166, %4, %cst_34 {dimension_numbers = #tpu.dot_dimension_numbers<[1], [0], [0], [1], [0, 0, 1, 1], [], []>} : vector<8x32xf32>, vector<32x96xf32>, vector<8x96xf32> -> vector<8x96xf32>
    %194 = vector.extract_strided_slice %192 {offsets = [0, 96], sizes = [8, 96], strides = [1, 1]} : vector<8x192xf32> to vector<8x96xf32>
    %195 = vector.extract_strided_slice %194 {offsets = [0, 0], sizes = [8, 64], strides = [1, 1]} : vector<8x96xf32> to vector<8x64xf32>
    %196 = vector.extract_strided_slice %193 {offsets = [0, 0], sizes = [8, 64], strides = [1, 1]} : vector<8x96xf32> to vector<8x64xf32>
    %197 = arith.addf %195, %196 : vector<8x64xf32>
    %198 = vector.broadcast %6 : vector<1x64xf32> to vector<8x64xf32>
    %199 = arith.addf %197, %198 : vector<8x64xf32>
    %200 = arith.negf %199 : vector<8x64xf32>
    %201 = math.exp %200 : vector<8x64xf32>
    %cst_35 = arith.constant 1.000000e+00 : f32
    %202 = vector.broadcast %cst_35 : f32 to vector<8x64xf32>
    %203 = arith.addf %202, %201 : vector<8x64xf32>
    %204 = arith.divf %202, %203 : vector<8x64xf32>
    %205 = vector.extract_strided_slice %194 {offsets = [0, 64], sizes = [8, 32], strides = [1, 1]} : vector<8x96xf32> to vector<8x32xf32>
    %206 = vector.broadcast %7 : vector<1x32xf32> to vector<8x32xf32>
    %207 = arith.addf %205, %206 : vector<8x32xf32>
    %208 = vector.extract_strided_slice %204 {offsets = [0, 0], sizes = [8, 32], strides = [1, 1]} : vector<8x64xf32> to vector<8x32xf32>
    %209 = vector.extract_strided_slice %193 {offsets = [0, 64], sizes = [8, 32], strides = [1, 1]} : vector<8x96xf32> to vector<8x32xf32>
    %210 = vector.broadcast %8 : vector<1x32xf32> to vector<8x32xf32>
    %211 = arith.addf %209, %210 : vector<8x32xf32>
    %212 = arith.mulf %208, %211 : vector<8x32xf32>
    %213 = arith.addf %207, %212 : vector<8x32xf32>
    %214 = math.tanh %213 : vector<8x32xf32>
    %215 = vector.extract_strided_slice %204 {offsets = [0, 32], sizes = [8, 32], strides = [1, 1]} : vector<8x64xf32> to vector<8x32xf32>
    %cst_36 = arith.constant 1.000000e+00 : f32
    %216 = vector.broadcast %cst_36 : f32 to vector<8x32xf32>
    %217 = arith.subf %216, %215 : vector<8x32xf32>
    %218 = arith.mulf %217, %214 : vector<8x32xf32>
    %219 = vector.extract_strided_slice %204 {offsets = [0, 32], sizes = [8, 32], strides = [1, 1]} : vector<8x64xf32> to vector<8x32xf32>
    %220 = arith.mulf %219, %166 : vector<8x32xf32>
    %221 = arith.addf %218, %220 : vector<8x32xf32>
    %222 = vector.extract_strided_slice %2 {offsets = [32, 0], sizes = [8, 96], strides = [1, 1]} : vector<64x96xf32> to vector<8x96xf32>
    %223 = vector.extract_strided_slice %192 {offsets = [0, 0], sizes = [8, 96], strides = [1, 1]} : vector<8x192xf32> to vector<8x96xf32>
    %224 = vector.extract_strided_slice %222 {offsets = [0, 0], sizes = [8, 64], strides = [1, 1]} : vector<8x96xf32> to vector<8x64xf32>
    %225 = vector.extract_strided_slice %223 {offsets = [0, 0], sizes = [8, 64], strides = [1, 1]} : vector<8x96xf32> to vector<8x64xf32>
    %226 = arith.addf %224, %225 : vector<8x64xf32>
    %227 = arith.negf %226 : vector<8x64xf32>
    %228 = math.exp %227 : vector<8x64xf32>
    %cst_37 = arith.constant 1.000000e+00 : f32
    %229 = vector.broadcast %cst_37 : f32 to vector<8x64xf32>
    %230 = arith.addf %229, %228 : vector<8x64xf32>
    %231 = arith.divf %229, %230 : vector<8x64xf32>
    %232 = vector.extract_strided_slice %222 {offsets = [0, 64], sizes = [8, 32], strides = [1, 1]} : vector<8x96xf32> to vector<8x32xf32>
    %233 = vector.extract_strided_slice %231 {offsets = [0, 0], sizes = [8, 32], strides = [1, 1]} : vector<8x64xf32> to vector<8x32xf32>
    %234 = vector.extract_strided_slice %223 {offsets = [0, 64], sizes = [8, 32], strides = [1, 1]} : vector<8x96xf32> to vector<8x32xf32>
    %235 = vector.broadcast %5 : vector<1x32xf32> to vector<8x32xf32>
    %236 = arith.addf %234, %235 : vector<8x32xf32>
    %237 = arith.mulf %233, %236 : vector<8x32xf32>
    %238 = arith.addf %232, %237 : vector<8x32xf32>
    %239 = math.tanh %238 : vector<8x32xf32>
    %240 = vector.extract_strided_slice %231 {offsets = [0, 32], sizes = [8, 32], strides = [1, 1]} : vector<8x64xf32> to vector<8x32xf32>
    %cst_38 = arith.constant 1.000000e+00 : f32
    %241 = vector.broadcast %cst_38 : f32 to vector<8x32xf32>
    %242 = arith.subf %241, %240 : vector<8x32xf32>
    %243 = arith.mulf %242, %239 : vector<8x32xf32>
    %244 = vector.extract_strided_slice %231 {offsets = [0, 32], sizes = [8, 32], strides = [1, 1]} : vector<8x64xf32> to vector<8x32xf32>
    %245 = arith.mulf %244, %191 : vector<8x32xf32>
    %246 = arith.addf %243, %245 : vector<8x32xf32>
    %cst_39 = arith.constant dense<0.000000e+00> : vector<8x192xf32>
    %247 = tpu.matmul %246, %3, %cst_39 {dimension_numbers = #tpu.dot_dimension_numbers<[1], [0], [0], [1], [0, 0, 1, 1], [], []>} : vector<8x32xf32>, vector<32x192xf32>, vector<8x192xf32> -> vector<8x192xf32>
    %cst_40 = arith.constant dense<0.000000e+00> : vector<8x96xf32>
    %248 = tpu.matmul %221, %4, %cst_40 {dimension_numbers = #tpu.dot_dimension_numbers<[1], [0], [0], [1], [0, 0, 1, 1], [], []>} : vector<8x32xf32>, vector<32x96xf32>, vector<8x96xf32> -> vector<8x96xf32>
    %249 = vector.extract_strided_slice %247 {offsets = [0, 96], sizes = [8, 96], strides = [1, 1]} : vector<8x192xf32> to vector<8x96xf32>
    %250 = vector.extract_strided_slice %249 {offsets = [0, 0], sizes = [8, 64], strides = [1, 1]} : vector<8x96xf32> to vector<8x64xf32>
    %251 = vector.extract_strided_slice %248 {offsets = [0, 0], sizes = [8, 64], strides = [1, 1]} : vector<8x96xf32> to vector<8x64xf32>
    %252 = arith.addf %250, %251 : vector<8x64xf32>
    %253 = vector.broadcast %6 : vector<1x64xf32> to vector<8x64xf32>
    %254 = arith.addf %252, %253 : vector<8x64xf32>
    %255 = arith.negf %254 : vector<8x64xf32>
    %256 = math.exp %255 : vector<8x64xf32>
    %cst_41 = arith.constant 1.000000e+00 : f32
    %257 = vector.broadcast %cst_41 : f32 to vector<8x64xf32>
    %258 = arith.addf %257, %256 : vector<8x64xf32>
    %259 = arith.divf %257, %258 : vector<8x64xf32>
    %260 = vector.extract_strided_slice %249 {offsets = [0, 64], sizes = [8, 32], strides = [1, 1]} : vector<8x96xf32> to vector<8x32xf32>
    %261 = vector.broadcast %7 : vector<1x32xf32> to vector<8x32xf32>
    %262 = arith.addf %260, %261 : vector<8x32xf32>
    %263 = vector.extract_strided_slice %259 {offsets = [0, 0], sizes = [8, 32], strides = [1, 1]} : vector<8x64xf32> to vector<8x32xf32>
    %264 = vector.extract_strided_slice %248 {offsets = [0, 64], sizes = [8, 32], strides = [1, 1]} : vector<8x96xf32> to vector<8x32xf32>
    %265 = vector.broadcast %8 : vector<1x32xf32> to vector<8x32xf32>
    %266 = arith.addf %264, %265 : vector<8x32xf32>
    %267 = arith.mulf %263, %266 : vector<8x32xf32>
    %268 = arith.addf %262, %267 : vector<8x32xf32>
    %269 = math.tanh %268 : vector<8x32xf32>
    %270 = vector.extract_strided_slice %259 {offsets = [0, 32], sizes = [8, 32], strides = [1, 1]} : vector<8x64xf32> to vector<8x32xf32>
    %cst_42 = arith.constant 1.000000e+00 : f32
    %271 = vector.broadcast %cst_42 : f32 to vector<8x32xf32>
    %272 = arith.subf %271, %270 : vector<8x32xf32>
    %273 = arith.mulf %272, %269 : vector<8x32xf32>
    %274 = vector.extract_strided_slice %259 {offsets = [0, 32], sizes = [8, 32], strides = [1, 1]} : vector<8x64xf32> to vector<8x32xf32>
    %275 = arith.mulf %274, %221 : vector<8x32xf32>
    %276 = arith.addf %273, %275 : vector<8x32xf32>
    %277 = vector.extract_strided_slice %2 {offsets = [40, 0], sizes = [8, 96], strides = [1, 1]} : vector<64x96xf32> to vector<8x96xf32>
    %278 = vector.extract_strided_slice %247 {offsets = [0, 0], sizes = [8, 96], strides = [1, 1]} : vector<8x192xf32> to vector<8x96xf32>
    %279 = vector.extract_strided_slice %277 {offsets = [0, 0], sizes = [8, 64], strides = [1, 1]} : vector<8x96xf32> to vector<8x64xf32>
    %280 = vector.extract_strided_slice %278 {offsets = [0, 0], sizes = [8, 64], strides = [1, 1]} : vector<8x96xf32> to vector<8x64xf32>
    %281 = arith.addf %279, %280 : vector<8x64xf32>
    %282 = arith.negf %281 : vector<8x64xf32>
    %283 = math.exp %282 : vector<8x64xf32>
    %cst_43 = arith.constant 1.000000e+00 : f32
    %284 = vector.broadcast %cst_43 : f32 to vector<8x64xf32>
    %285 = arith.addf %284, %283 : vector<8x64xf32>
    %286 = arith.divf %284, %285 : vector<8x64xf32>
    %287 = vector.extract_strided_slice %277 {offsets = [0, 64], sizes = [8, 32], strides = [1, 1]} : vector<8x96xf32> to vector<8x32xf32>
    %288 = vector.extract_strided_slice %286 {offsets = [0, 0], sizes = [8, 32], strides = [1, 1]} : vector<8x64xf32> to vector<8x32xf32>
    %289 = vector.extract_strided_slice %278 {offsets = [0, 64], sizes = [8, 32], strides = [1, 1]} : vector<8x96xf32> to vector<8x32xf32>
    %290 = vector.broadcast %5 : vector<1x32xf32> to vector<8x32xf32>
    %291 = arith.addf %289, %290 : vector<8x32xf32>
    %292 = arith.mulf %288, %291 : vector<8x32xf32>
    %293 = arith.addf %287, %292 : vector<8x32xf32>
    %294 = math.tanh %293 : vector<8x32xf32>
    %295 = vector.extract_strided_slice %286 {offsets = [0, 32], sizes = [8, 32], strides = [1, 1]} : vector<8x64xf32> to vector<8x32xf32>
    %cst_44 = arith.constant 1.000000e+00 : f32
    %296 = vector.broadcast %cst_44 : f32 to vector<8x32xf32>
    %297 = arith.subf %296, %295 : vector<8x32xf32>
    %298 = arith.mulf %297, %294 : vector<8x32xf32>
    %299 = vector.extract_strided_slice %286 {offsets = [0, 32], sizes = [8, 32], strides = [1, 1]} : vector<8x64xf32> to vector<8x32xf32>
    %300 = arith.mulf %299, %246 : vector<8x32xf32>
    %301 = arith.addf %298, %300 : vector<8x32xf32>
    %cst_45 = arith.constant dense<0.000000e+00> : vector<8x192xf32>
    %302 = tpu.matmul %301, %3, %cst_45 {dimension_numbers = #tpu.dot_dimension_numbers<[1], [0], [0], [1], [0, 0, 1, 1], [], []>} : vector<8x32xf32>, vector<32x192xf32>, vector<8x192xf32> -> vector<8x192xf32>
    %cst_46 = arith.constant dense<0.000000e+00> : vector<8x96xf32>
    %303 = tpu.matmul %276, %4, %cst_46 {dimension_numbers = #tpu.dot_dimension_numbers<[1], [0], [0], [1], [0, 0, 1, 1], [], []>} : vector<8x32xf32>, vector<32x96xf32>, vector<8x96xf32> -> vector<8x96xf32>
    %304 = vector.extract_strided_slice %302 {offsets = [0, 96], sizes = [8, 96], strides = [1, 1]} : vector<8x192xf32> to vector<8x96xf32>
    %305 = vector.extract_strided_slice %304 {offsets = [0, 0], sizes = [8, 64], strides = [1, 1]} : vector<8x96xf32> to vector<8x64xf32>
    %306 = vector.extract_strided_slice %303 {offsets = [0, 0], sizes = [8, 64], strides = [1, 1]} : vector<8x96xf32> to vector<8x64xf32>
    %307 = arith.addf %305, %306 : vector<8x64xf32>
    %308 = vector.broadcast %6 : vector<1x64xf32> to vector<8x64xf32>
    %309 = arith.addf %307, %308 : vector<8x64xf32>
    %310 = arith.negf %309 : vector<8x64xf32>
    %311 = math.exp %310 : vector<8x64xf32>
    %cst_47 = arith.constant 1.000000e+00 : f32
    %312 = vector.broadcast %cst_47 : f32 to vector<8x64xf32>
    %313 = arith.addf %312, %311 : vector<8x64xf32>
    %314 = arith.divf %312, %313 : vector<8x64xf32>
    %315 = vector.extract_strided_slice %304 {offsets = [0, 64], sizes = [8, 32], strides = [1, 1]} : vector<8x96xf32> to vector<8x32xf32>
    %316 = vector.broadcast %7 : vector<1x32xf32> to vector<8x32xf32>
    %317 = arith.addf %315, %316 : vector<8x32xf32>
    %318 = vector.extract_strided_slice %314 {offsets = [0, 0], sizes = [8, 32], strides = [1, 1]} : vector<8x64xf32> to vector<8x32xf32>
    %319 = vector.extract_strided_slice %303 {offsets = [0, 64], sizes = [8, 32], strides = [1, 1]} : vector<8x96xf32> to vector<8x32xf32>
    %320 = vector.broadcast %8 : vector<1x32xf32> to vector<8x32xf32>
    %321 = arith.addf %319, %320 : vector<8x32xf32>
    %322 = arith.mulf %318, %321 : vector<8x32xf32>
    %323 = arith.addf %317, %322 : vector<8x32xf32>
    %324 = math.tanh %323 : vector<8x32xf32>
    %325 = vector.extract_strided_slice %314 {offsets = [0, 32], sizes = [8, 32], strides = [1, 1]} : vector<8x64xf32> to vector<8x32xf32>
    %cst_48 = arith.constant 1.000000e+00 : f32
    %326 = vector.broadcast %cst_48 : f32 to vector<8x32xf32>
    %327 = arith.subf %326, %325 : vector<8x32xf32>
    %328 = arith.mulf %327, %324 : vector<8x32xf32>
    %329 = vector.extract_strided_slice %314 {offsets = [0, 32], sizes = [8, 32], strides = [1, 1]} : vector<8x64xf32> to vector<8x32xf32>
    %330 = arith.mulf %329, %276 : vector<8x32xf32>
    %331 = arith.addf %328, %330 : vector<8x32xf32>
    %332 = vector.extract_strided_slice %2 {offsets = [48, 0], sizes = [8, 96], strides = [1, 1]} : vector<64x96xf32> to vector<8x96xf32>
    %333 = vector.extract_strided_slice %302 {offsets = [0, 0], sizes = [8, 96], strides = [1, 1]} : vector<8x192xf32> to vector<8x96xf32>
    %334 = vector.extract_strided_slice %332 {offsets = [0, 0], sizes = [8, 64], strides = [1, 1]} : vector<8x96xf32> to vector<8x64xf32>
    %335 = vector.extract_strided_slice %333 {offsets = [0, 0], sizes = [8, 64], strides = [1, 1]} : vector<8x96xf32> to vector<8x64xf32>
    %336 = arith.addf %334, %335 : vector<8x64xf32>
    %337 = arith.negf %336 : vector<8x64xf32>
    %338 = math.exp %337 : vector<8x64xf32>
    %cst_49 = arith.constant 1.000000e+00 : f32
    %339 = vector.broadcast %cst_49 : f32 to vector<8x64xf32>
    %340 = arith.addf %339, %338 : vector<8x64xf32>
    %341 = arith.divf %339, %340 : vector<8x64xf32>
    %342 = vector.extract_strided_slice %332 {offsets = [0, 64], sizes = [8, 32], strides = [1, 1]} : vector<8x96xf32> to vector<8x32xf32>
    %343 = vector.extract_strided_slice %341 {offsets = [0, 0], sizes = [8, 32], strides = [1, 1]} : vector<8x64xf32> to vector<8x32xf32>
    %344 = vector.extract_strided_slice %333 {offsets = [0, 64], sizes = [8, 32], strides = [1, 1]} : vector<8x96xf32> to vector<8x32xf32>
    %345 = vector.broadcast %5 : vector<1x32xf32> to vector<8x32xf32>
    %346 = arith.addf %344, %345 : vector<8x32xf32>
    %347 = arith.mulf %343, %346 : vector<8x32xf32>
    %348 = arith.addf %342, %347 : vector<8x32xf32>
    %349 = math.tanh %348 : vector<8x32xf32>
    %350 = vector.extract_strided_slice %341 {offsets = [0, 32], sizes = [8, 32], strides = [1, 1]} : vector<8x64xf32> to vector<8x32xf32>
    %cst_50 = arith.constant 1.000000e+00 : f32
    %351 = vector.broadcast %cst_50 : f32 to vector<8x32xf32>
    %352 = arith.subf %351, %350 : vector<8x32xf32>
    %353 = arith.mulf %352, %349 : vector<8x32xf32>
    %354 = vector.extract_strided_slice %341 {offsets = [0, 32], sizes = [8, 32], strides = [1, 1]} : vector<8x64xf32> to vector<8x32xf32>
    %355 = arith.mulf %354, %301 : vector<8x32xf32>
    %356 = arith.addf %353, %355 : vector<8x32xf32>
    %cst_51 = arith.constant dense<0.000000e+00> : vector<8x192xf32>
    %357 = tpu.matmul %356, %3, %cst_51 {dimension_numbers = #tpu.dot_dimension_numbers<[1], [0], [0], [1], [0, 0, 1, 1], [], []>} : vector<8x32xf32>, vector<32x192xf32>, vector<8x192xf32> -> vector<8x192xf32>
    %cst_52 = arith.constant dense<0.000000e+00> : vector<8x96xf32>
    %358 = tpu.matmul %331, %4, %cst_52 {dimension_numbers = #tpu.dot_dimension_numbers<[1], [0], [0], [1], [0, 0, 1, 1], [], []>} : vector<8x32xf32>, vector<32x96xf32>, vector<8x96xf32> -> vector<8x96xf32>
    %359 = vector.extract_strided_slice %357 {offsets = [0, 96], sizes = [8, 96], strides = [1, 1]} : vector<8x192xf32> to vector<8x96xf32>
    %360 = vector.extract_strided_slice %359 {offsets = [0, 0], sizes = [8, 64], strides = [1, 1]} : vector<8x96xf32> to vector<8x64xf32>
    %361 = vector.extract_strided_slice %358 {offsets = [0, 0], sizes = [8, 64], strides = [1, 1]} : vector<8x96xf32> to vector<8x64xf32>
    %362 = arith.addf %360, %361 : vector<8x64xf32>
    %363 = vector.broadcast %6 : vector<1x64xf32> to vector<8x64xf32>
    %364 = arith.addf %362, %363 : vector<8x64xf32>
    %365 = arith.negf %364 : vector<8x64xf32>
    %366 = math.exp %365 : vector<8x64xf32>
    %cst_53 = arith.constant 1.000000e+00 : f32
    %367 = vector.broadcast %cst_53 : f32 to vector<8x64xf32>
    %368 = arith.addf %367, %366 : vector<8x64xf32>
    %369 = arith.divf %367, %368 : vector<8x64xf32>
    %370 = vector.extract_strided_slice %359 {offsets = [0, 64], sizes = [8, 32], strides = [1, 1]} : vector<8x96xf32> to vector<8x32xf32>
    %371 = vector.broadcast %7 : vector<1x32xf32> to vector<8x32xf32>
    %372 = arith.addf %370, %371 : vector<8x32xf32>
    %373 = vector.extract_strided_slice %369 {offsets = [0, 0], sizes = [8, 32], strides = [1, 1]} : vector<8x64xf32> to vector<8x32xf32>
    %374 = vector.extract_strided_slice %358 {offsets = [0, 64], sizes = [8, 32], strides = [1, 1]} : vector<8x96xf32> to vector<8x32xf32>
    %375 = vector.broadcast %8 : vector<1x32xf32> to vector<8x32xf32>
    %376 = arith.addf %374, %375 : vector<8x32xf32>
    %377 = arith.mulf %373, %376 : vector<8x32xf32>
    %378 = arith.addf %372, %377 : vector<8x32xf32>
    %379 = math.tanh %378 : vector<8x32xf32>
    %380 = vector.extract_strided_slice %369 {offsets = [0, 32], sizes = [8, 32], strides = [1, 1]} : vector<8x64xf32> to vector<8x32xf32>
    %cst_54 = arith.constant 1.000000e+00 : f32
    %381 = vector.broadcast %cst_54 : f32 to vector<8x32xf32>
    %382 = arith.subf %381, %380 : vector<8x32xf32>
    %383 = arith.mulf %382, %379 : vector<8x32xf32>
    %384 = vector.extract_strided_slice %369 {offsets = [0, 32], sizes = [8, 32], strides = [1, 1]} : vector<8x64xf32> to vector<8x32xf32>
    %385 = arith.mulf %384, %331 : vector<8x32xf32>
    %386 = arith.addf %383, %385 : vector<8x32xf32>
    %387 = vector.extract_strided_slice %2 {offsets = [56, 0], sizes = [8, 96], strides = [1, 1]} : vector<64x96xf32> to vector<8x96xf32>
    %388 = vector.extract_strided_slice %357 {offsets = [0, 0], sizes = [8, 96], strides = [1, 1]} : vector<8x192xf32> to vector<8x96xf32>
    %389 = vector.extract_strided_slice %387 {offsets = [0, 0], sizes = [8, 64], strides = [1, 1]} : vector<8x96xf32> to vector<8x64xf32>
    %390 = vector.extract_strided_slice %388 {offsets = [0, 0], sizes = [8, 64], strides = [1, 1]} : vector<8x96xf32> to vector<8x64xf32>
    %391 = arith.addf %389, %390 : vector<8x64xf32>
    %392 = arith.negf %391 : vector<8x64xf32>
    %393 = math.exp %392 : vector<8x64xf32>
    %cst_55 = arith.constant 1.000000e+00 : f32
    %394 = vector.broadcast %cst_55 : f32 to vector<8x64xf32>
    %395 = arith.addf %394, %393 : vector<8x64xf32>
    %396 = arith.divf %394, %395 : vector<8x64xf32>
    %397 = vector.extract_strided_slice %387 {offsets = [0, 64], sizes = [8, 32], strides = [1, 1]} : vector<8x96xf32> to vector<8x32xf32>
    %398 = vector.extract_strided_slice %396 {offsets = [0, 0], sizes = [8, 32], strides = [1, 1]} : vector<8x64xf32> to vector<8x32xf32>
    %399 = vector.extract_strided_slice %388 {offsets = [0, 64], sizes = [8, 32], strides = [1, 1]} : vector<8x96xf32> to vector<8x32xf32>
    %400 = vector.broadcast %5 : vector<1x32xf32> to vector<8x32xf32>
    %401 = arith.addf %399, %400 : vector<8x32xf32>
    %402 = arith.mulf %398, %401 : vector<8x32xf32>
    %403 = arith.addf %397, %402 : vector<8x32xf32>
    %404 = math.tanh %403 : vector<8x32xf32>
    %405 = vector.extract_strided_slice %396 {offsets = [0, 32], sizes = [8, 32], strides = [1, 1]} : vector<8x64xf32> to vector<8x32xf32>
    %cst_56 = arith.constant 1.000000e+00 : f32
    %406 = vector.broadcast %cst_56 : f32 to vector<8x32xf32>
    %407 = arith.subf %406, %405 : vector<8x32xf32>
    %408 = arith.mulf %407, %404 : vector<8x32xf32>
    %409 = vector.extract_strided_slice %396 {offsets = [0, 32], sizes = [8, 32], strides = [1, 1]} : vector<8x64xf32> to vector<8x32xf32>
    %410 = arith.mulf %409, %356 : vector<8x32xf32>
    %411 = arith.addf %408, %410 : vector<8x32xf32>
    %cst_57 = arith.constant dense<0.000000e+00> : vector<8x192xf32>
    %412 = tpu.matmul %411, %3, %cst_57 {dimension_numbers = #tpu.dot_dimension_numbers<[1], [0], [0], [1], [0, 0, 1, 1], [], []>} : vector<8x32xf32>, vector<32x192xf32>, vector<8x192xf32> -> vector<8x192xf32>
    %cst_58 = arith.constant dense<0.000000e+00> : vector<8x96xf32>
    %413 = tpu.matmul %386, %4, %cst_58 {dimension_numbers = #tpu.dot_dimension_numbers<[1], [0], [0], [1], [0, 0, 1, 1], [], []>} : vector<8x32xf32>, vector<32x96xf32>, vector<8x96xf32> -> vector<8x96xf32>
    %414 = vector.extract_strided_slice %412 {offsets = [0, 96], sizes = [8, 96], strides = [1, 1]} : vector<8x192xf32> to vector<8x96xf32>
    %415 = vector.extract_strided_slice %414 {offsets = [0, 0], sizes = [8, 64], strides = [1, 1]} : vector<8x96xf32> to vector<8x64xf32>
    %416 = vector.extract_strided_slice %413 {offsets = [0, 0], sizes = [8, 64], strides = [1, 1]} : vector<8x96xf32> to vector<8x64xf32>
    %417 = arith.addf %415, %416 : vector<8x64xf32>
    %418 = vector.broadcast %6 : vector<1x64xf32> to vector<8x64xf32>
    %419 = arith.addf %417, %418 : vector<8x64xf32>
    %420 = arith.negf %419 : vector<8x64xf32>
    %421 = math.exp %420 : vector<8x64xf32>
    %cst_59 = arith.constant 1.000000e+00 : f32
    %422 = vector.broadcast %cst_59 : f32 to vector<8x64xf32>
    %423 = arith.addf %422, %421 : vector<8x64xf32>
    %424 = arith.divf %422, %423 : vector<8x64xf32>
    %425 = vector.extract_strided_slice %414 {offsets = [0, 64], sizes = [8, 32], strides = [1, 1]} : vector<8x96xf32> to vector<8x32xf32>
    %426 = vector.broadcast %7 : vector<1x32xf32> to vector<8x32xf32>
    %427 = arith.addf %425, %426 : vector<8x32xf32>
    %428 = vector.extract_strided_slice %424 {offsets = [0, 0], sizes = [8, 32], strides = [1, 1]} : vector<8x64xf32> to vector<8x32xf32>
    %429 = vector.extract_strided_slice %413 {offsets = [0, 64], sizes = [8, 32], strides = [1, 1]} : vector<8x96xf32> to vector<8x32xf32>
    %430 = vector.broadcast %8 : vector<1x32xf32> to vector<8x32xf32>
    %431 = arith.addf %429, %430 : vector<8x32xf32>
    %432 = arith.mulf %428, %431 : vector<8x32xf32>
    %433 = arith.addf %427, %432 : vector<8x32xf32>
    %434 = math.tanh %433 : vector<8x32xf32>
    %435 = vector.extract_strided_slice %424 {offsets = [0, 32], sizes = [8, 32], strides = [1, 1]} : vector<8x64xf32> to vector<8x32xf32>
    %cst_60 = arith.constant 1.000000e+00 : f32
    %436 = vector.broadcast %cst_60 : f32 to vector<8x32xf32>
    %437 = arith.subf %436, %435 : vector<8x32xf32>
    %438 = arith.mulf %437, %434 : vector<8x32xf32>
    %439 = vector.extract_strided_slice %424 {offsets = [0, 32], sizes = [8, 32], strides = [1, 1]} : vector<8x64xf32> to vector<8x32xf32>
    %440 = arith.mulf %439, %386 : vector<8x32xf32>
    %441 = arith.addf %438, %440 : vector<8x32xf32>
    %442 = tpu.concatenate %56, %111, %166, %221, %276, %331, %386, %441 in 0 : vector<8x32xf32>, vector<8x32xf32>, vector<8x32xf32>, vector<8x32xf32>, vector<8x32xf32>, vector<8x32xf32>, vector<8x32xf32>, vector<8x32xf32> -> vector<64x32xf32>
    %c0_61 = arith.constant 0 : index
    %c0_62 = arith.constant 0 : index
    %443 = vector.load %arg4[%c0_61, %c0_62] : memref<64x32xf32, #tpu.memory_space<vmem>>, vector<32x32xf32>
    %cst_63 = arith.constant dense<0.000000e+00> : vector<64x32xf32>
    %444 = tpu.matmul %442, %443, %cst_63 {dimension_numbers = #tpu.dot_dimension_numbers<[1], [0], [0], [1], [0, 0, 1, 1], [], []>} : vector<64x32xf32>, vector<32x32xf32>, vector<64x32xf32> -> vector<64x32xf32>
    %c0_64 = arith.constant 0 : index
    %c160 = arith.constant 160 : index
    %445 = vector.load %arg5[%c0_64, %c160] : memref<1x198xf32, #tpu.memory_space<vmem>>, vector<1x32xf32>
    %446 = vector.broadcast %445 : vector<1x32xf32> to vector<64x32xf32>
    %447 = arith.addf %444, %446 : vector<64x32xf32>
    %448 = math.tanh %447 : vector<64x32xf32>
    %c32_65 = arith.constant 32 : index
    %c0_66 = arith.constant 0 : index
    %449 = vector.load %arg4[%c32_65, %c0_66] : memref<64x32xf32, #tpu.memory_space<vmem>>, vector<32x6xf32>
    %cst_67 = arith.constant dense<0.000000e+00> : vector<64x6xf32>
    %450 = tpu.matmul %448, %449, %cst_67 {dimension_numbers = #tpu.dot_dimension_numbers<[1], [0], [0], [1], [0, 0, 1, 1], [], []>} : vector<64x32xf32>, vector<32x6xf32>, vector<64x6xf32> -> vector<64x6xf32>
    %c0_68 = arith.constant 0 : index
    %c192 = arith.constant 192 : index
    %451 = vector.load %arg5[%c0_68, %c192] : memref<1x198xf32, #tpu.memory_space<vmem>>, vector<1x6xf32>
    %452 = vector.broadcast %451 : vector<1x6xf32> to vector<64x6xf32>
    %453 = arith.addf %450, %452 : vector<64x6xf32>
    %c0_69 = arith.constant 0 : index
    %c0_70 = arith.constant 0 : index
    %454 = vector.load %arg6[%c0_69, %c0_70] : memref<64x6xf32, #tpu.memory_space<vmem>>, vector<64x6xf32>
    tpu.vector_store %arg6[%c0_69, %c0_70], %453 {strides = array<i32>} : memref<64x6xf32, #tpu.memory_space<vmem>>, vector<64x6xf32>,
    return
  }
}

</mosaic_0001>

<bundles_post_ra>
// kernel: forward.1
= control target key start
LH: loop header
LB: loop body
LE: loop exit
PB: predicated region body
PF: predicated region fallthrough
CT: control target
= control target key end

     0   :  { %vm32_vm0 = vcmask 64512   ;;  %s1896_s26 = smov 64   ;;  %s1897_s29 = smov 96   ;;  %v1898_v37 = vmov 0.0   ;;  %vm150_vm5 = vcmask 261120   ;;  %s2509_s1 = inlined_call_operand.vmem [shape: f32[8,96], index: 1, kind: input, shape index: {}]   ;;  %s2510_s0 = inlined_call_operand.vmem [shape: f32[64,8], index: 0, kind: input, shape index: {}]   ;;  %s2511_s5 = inlined_call_operand.vmem [shape: f32[1,198], index: 5, kind: input, shape index: {}]   ;;  %s2512_s3 = inlined_call_operand.vmem [shape: f32[32,96], index: 3, kind: input, shape index: {}]   ;;  %s2513_s2 = inlined_call_operand.vmem [shape: f32[32,192], index: 2, kind: input, shape index: {}]   ;;  %s2514_s4 = inlined_call_operand.vmem [shape: f32[64,32], index: 4, kind: input, shape index: {}]   ;;  %s2515_s6 = inlined_call_operand.vmem [shape: f32[64,6], index: 6, kind: output, shape index: {}]  }
   0x1   :  { %v31_v0 = vld [vmem:[%s2509_s1] sm:$0xff]  ;;  %v28_v18 = vld [vmem:[%s2510_s0 + $0x28] sm:$0xff]  ;;  %v29_v22 = vld [vmem:[%s2510_s0 + $0x30] sm:$0xff]  ;;  %s1899_s15 = smov 32  }
   0x2   :  { %v23_v1 = vld [vmem:[%s2510_s0] sm:$0xff]  ;;  %72 = vmatpush.msra.mxu0 %v31_v0  ;;  %1728 = vmatpush.msra.mxu3 %v31_v0  ;;  %v1963_v23 = vld [vmem:[%s2512_s3 + $0x18] sm:$0xff]  ;;  %v1969_v24 = vld [vmem:[%s2512_s3 + $0x10] sm:$0xff] }
   0x3   :  { %1657 = vmatmul.msk.f32.vlgmr.msra.gmra.mxu0 %vm32_vm0, %v23_v1  ;;  %v1945_v13 = vld [vmem:[%s2511_s5] ss:$0 sm:$0xff]  ;;  %1662 = vmatmul.msk.f32.vlgmr.msra.gmra.mxu3 %vm32_vm0, %v28_v18  ;;  %v1738_v25 = vld [vmem:[%s2511_s5 + $0x1] ss:$0 sm:$0xff]  ;;  %v1978_v26 = vld [vmem:[%s2513_s2 + $0x30] sm:$0xff] }
   0x4   :  { %208 = vmatpush.msrb.mxu3 %v1963_v23  ;;  %v1983_v27 = vld [vmem:[%s2513_s2 + $0x38] sm:$0xff]  ;;  %v1988_v28 = vld [vmem:[%s2512_s3 + $0x8] sm:$0xff]  ;;  %165 = vmatpush.msra.mxu1 %v1978_v26  ;;  %v1995_v29 = vld [vmem:[%s2513_s2 + $0x20] sm:$0xff] }
   0x5   :  { %185 = vmatpush.msra.mxu2 %v1983_v27  ;;  %v2000_v30 = vld [vmem:[%s2513_s2 + $0x28] sm:$0xff]  ;;  %268 = vrot.lane.b32.xlu2 %v1738_v25, %s1896_s26  ;;  %v2007_v31 = vld [vmem:[%s2513_s2 + $0x10] sm:$0xff]  ;;  %v2012_v32 = vld [vmem:[%s2513_s2 + $0x18] sm:$0xff] }
   0x6   :  { %209 = vmatpush.msrb.mxu3 %v1969_v24  ;;  %v2017_v33 = vld [vmem:[%s2512_s3] sm:$0xff]  ;;  %166 = vmatpush.msra.mxu1 %v1995_v29  ;;  %v30_v34 = vld [vmem:[%s2510_s0 + $0x38] sm:$0xff]  ;;  %v2035_v36 = vld [vmem:[%s2513_s2 + $0x8] sm:$0xff] }
   0x7   :  { %186 = vmatpush.msra.mxu2 %v2000_v30  ;;  %v2028_v35 = vld [vmem:[%s2513_s2] sm:$0xff]  ;;  %v24_v41 = vld [vmem:[%s2510_s0 + $0x8] sm:$0xff] }
   0x8   :  { %210 = vmatpush.msrb.mxu3 %v1988_v28  ;;  %167 = vmatpush.msra.mxu1 %v2007_v31 }
   0x9   :  { %187 = vmatpush.msra.mxu2 %v2012_v32 }
   0xa   :  { %211 = vmatpush.msrb.mxu3 %v2017_v33  ;;  %168 = vmatpush.msra.mxu1 %v2028_v35 }
   0xb   :  { %1663 = vmatmul.msk.f32.gmra.mxu3 %vm32_vm0, %v29_v22  ;;  %188 = vmatpush.msra.mxu2 %v2035_v36 }
   0xc   :  { %391 = vmatpush.msra.mxu3 %v1963_v23  ;;  %348 = vmatpush.msrb.mxu1 %v1978_v26 }
   0xd   :  { %368 = vmatpush.msrb.mxu2 %v1983_v27  ;;  %1658 = vmatmul.msk.f32.gmra.mxu0 %vm32_vm0, %v24_v41  ;;  %v25_v41 = vld [vmem:[%s2510_s0 + $0x10] sm:$0xff] }
   0xe   :  { %392 = vmatpush.msra.mxu3 %v1969_v24  ;;  %349 = vmatpush.msrb.mxu1 %v1995_v29 }
   0xf   :  { %369 = vmatpush.msrb.mxu2 %v2000_v30 }
  0x10   :  { %393 = vmatpush.msra.mxu3 %v1988_v28  ;;  %350 = vmatpush.msrb.mxu1 %v2007_v31 }
  0x11   :  { %370 = vmatpush.msrb.mxu2 %v2012_v32 }
  0x12   :  { %394 = vmatpush.msra.mxu3 %v2017_v33  ;;  %351 = vmatpush.msrb.mxu1 %v2028_v35 }
  0x13   :  { %1664 = vmatmul.msk.f32.gmra.mxu3 %vm32_vm0, %v30_v34  ;;  %371 = vmatpush.msrb.mxu2 %v2035_v36 }
  0x15   :  { %1659 = vmatmul.msk.f32.gmra.mxu0 %vm32_vm0, %v25_v41 }
  0x1b   :  { %212 = vmatmul.f32.vlgmr.msrb.gmra.mxu3 %v1898_v37 }
  0x1c   :  { %566 = vmatpush.msrb.mxu3 %v1963_v23 }
  0x1e   :  { %567 = vmatpush.msrb.mxu3 %v1969_v24 }
  0x20   :  { %568 = vmatpush.msrb.mxu3 %v1988_v28 }
  0x22   :  { %569 = vmatpush.msrb.mxu3 %v2017_v33 }
  0x5f   :  { %v2074_v46 = vpop.permute.xlu2 %268 }
  0x80   :  { %v74_v2 = vpop.f32.mrf.mxu0 }
  0x81   :  { %v1665_v3 = vmul.f32 -1.442695, %v74_v2 }
  0x83   :  { %1739 = vpow2.f32 %v1665_v3 }
  0x86   :  { %v2068_v42 = vpop.f32.mrf.mxu3 }
  0x89   :  { %v1740_v4 = vpop.eup %1739 }
  0x8a   :  { %v115_v5 = vadd.f32 1.0, %v1740_v4 }
  0x8c   :  { %1741 = vrcp.f32 %v115_v5  ;;  %v127_v9 = vand.u32 2147483648, %v115_v5  ;;  %v125_v11 = vand.u32 2147483647, %v115_v5  ;;  %vm121_vm2 = vweird.f32 %v115_v5 }
  0x8e   :  { %v128_v14 = vor.u32 1.1754944e-38, %v127_v9  ;;  %vm126_vm4 = vcmp.eq.f32.partialorder %v125_v11, 8.507059e+37  ;;  %v2070_v43 = vpop.f32.mrf.mxu3 }
  0x92   :  { %v1742_v6 = vpop.eup %1741 }
  0x93   :  { %v117_v7 = vmul.f32 %v1742_v6, %v115_v5  ;;  %vm122_vm1 = vweird.f32 %v1742_v6 }
  0x94   :  { %vm123_vm3 = vmor %vm121_vm2, %vm122_vm1 }
  0x95   :  { %v118_v8 = vsub.f32 1.0, %v117_v7 }
  0x96   :  { %v2072_v44 = vpop.f32.mrf.mxu3 }
  0x97   :  { %v119_v10 = vmul.f32 %v1742_v6, %v118_v8 }
  0x99   :  { %v120_v12 = vadd.f32 %v1742_v6, %v119_v10 }
  0x9b   :  { %v124_v15 = vsel %vm123_vm3, %v1742_v6, %v120_v12  ;;  %v77_v6 = vpop.f32.mrf.mxu0 }
  0x9c   :  { %v1947_v16 = vsel %vm126_vm4, %v128_v14, %v124_v15 }
  0x9d   :  { %v134_v17 = vmul.f32 %v1945_v13, %v1947_v16  ;;  %v141_v38 = vsub.f32 1.0, %v1947_v16 }
  0x9e   :  { %v213_v47 = vpop.f32.mrf.mxu3 }
  0x9f   :  { %136 = vrot.lane.b32.xlu0 %v134_v17, %s1896_s26  ;;  %217 = vrot.lane.b32.xlu2 %v213_v47, %s1897_s29  ;;  %v271_v48 = vadd.f32 %v2074_v46, %v213_v47  ;;  %v1518_v47 = vld [vmem:[%s2514_s4 + $0x10] sm:$0xff] }
  0xf9   :  { %v2089_v49 = vpop.permute.xlu2 %217 }
 0x111   :  { %v137_v19 = vpop.permute.xlu0 %136 }
 0x112   :  { %v139_v20 = vadd.f32 %v137_v19, %v74_v2 }
 0x114   :  { %1743 = vtanh.f32 %v139_v20 }
 0x11a   :  { %v1744_v21 = vpop.eup %1743 }
 0x11b   :  { %143 = vrot.lane.b32.xlu0 %v1744_v21, %s1897_s29 }
 0x18d   :  { %v144_v39 = vpop.permute.xlu0 %143 }
 0x18e   :  { %v2058_v40 = vmul.f32 %v144_v39, %v141_v38 }
 0x190   :  { %148 = vrot.lane.b32.xlu1 %v2058_v40, %s1897_s29 }
 0x198   :  { %222 = vrot.lane.b32.xlu1 %v1945_v13, %s1896_s26 }
 0x1a0   :  { %273 = vrot.lane.b32.xlu1 %v271_v48, %s1899_s15 }
 0x202   :  { %v149_v45 = vpop.permute.xlu1 %148 }
 0x203   :  { %1666 = vmatmul.msk.f32.vlgmr.msra.gmra.mxu1 %vm150_vm5, %v149_v45  ;;  %1667 = vmatmul.msk.f32.vlgmr.msra.gmra.mxu2 %vm150_vm5, %v149_v45  ;;  %v1519_v45 = vld [vmem:[%s2514_s4 + $0x18] sm:$0xff] }
 0x204   :  { %523 = vmatpush.msra.mxu1 %v1978_v26  ;;  %543 = vmatpush.msra.mxu2 %v1983_v27 }
 0x205   :  { %1538 = vmatpush.msrb.mxu0 %v1519_v45 }
 0x206   :  { %524 = vmatpush.msra.mxu1 %v1995_v29  ;;  %544 = vmatpush.msra.mxu2 %v2000_v30 }
 0x207   :  { %1539 = vmatpush.msrb.mxu0 %v1518_v47 }
 0x208   :  { %525 = vmatpush.msra.mxu1 %v2007_v31  ;;  %545 = vmatpush.msra.mxu2 %v2012_v32 }
 0x20a   :  { %526 = vmatpush.msra.mxu1 %v2028_v35  ;;  %546 = vmatpush.msra.mxu2 %v2035_v36  ;;  %v2091_v50 = vpop.permute.xlu1 %222 }
 0x212   :  { %v274_v2 = vpop.permute.xlu1 %273 }
 0x280   :  { %v170_v51 = vpop.f32.mrf.mxu1 }
 0x281   :  { %v220_v52 = vadd.f32 %v2089_v49, %v170_v51  ;;  %v311_v53 = vadd.f32 %v2091_v50, %v170_v51  ;;  %v291_v7 = vadd.f32 %v170_v51, %v77_v6  ;;  %v26_v51 = vld [vmem:[%s2510_s0 + $0x18] sm:$0xff] }
 0x282   :  { %1660 = vmatmul.msk.f32.gmra.mxu0 %vm32_vm0, %v26_v51 }
 0x283   :  { %313 = vrot.lane.b32.xlu0 %v311_v53, %s1896_s26  ;;  %v225_v54 = vadd.f32 %v2091_v50, %v220_v52  ;;  %v1670_v8 = vmul.f32 -1.442695, %v291_v7 }
 0x285   :  { %v1668_v55 = vmul.f32 -1.442695, %v225_v54  ;;  %v27_v54 = vld [vmem:[%s2510_s0 + $0x20] sm:$0xff] }
 0x286   :  { %v190_v25 = vpop.f32.mrf.mxu2 }
 0x287   :  { %1745 = vpow2.f32 %v1668_v55  ;;  %v265_v34 = vadd.f32 %v2091_v50, %v190_v25  ;;  %v221_v48 = vadd.f32 %v2089_v49, %v190_v25 }
 0x289   :  { %v226_v52 = vadd.f32 %v2091_v50, %v221_v48 }
 0x28a   :  { %1661 = vmatmul.msk.f32.gmra.mxu0 %vm32_vm0, %v27_v54 }
 0x28b   :  { %v1669_v53 = vmul.f32 -1.442695, %v226_v52 }
 0x28d   :  { %v1746_v56 = vpop.eup %1745 }
 0x28e   :  { %v233_v57 = vadd.f32 1.0, %v1746_v56 }
 0x290   :  { %1747 = vrcp.f32 %v233_v57  ;;  %v246_v61 = vand.u32 2147483648, %v233_v57  ;;  %v244_v63 = vand.u32 2147483647, %v233_v57  ;;  %vm240_vm7 = vweird.f32 %v233_v57 }
 0x291   :  { %1749 = vpow2.f32 %v1670_v8 }
 0x292   :  { %v247_v1 = vor.u32 1.1754944e-38, %v246_v61  ;;  %vm245_vm9 = vcmp.eq.f32.partialorder %v244_v63, 8.507059e+37 }
 0x296   :  { %v1748_v58 = vpop.eup %1747 }
 0x297   :  { %v236_v59 = vmul.f32 %v1748_v58, %v233_v57  ;;  %vm241_vm6 = vweird.f32 %v1748_v58  ;;  %v1750_v9 = vpop.eup %1749 }
 0x298   :  { %vm242_vm8 = vmor %vm240_vm7, %vm241_vm6  ;;  %v295_v10 = vadd.f32 1.0, %v1750_v9 }
 0x299   :  { %v237_v60 = vsub.f32 1.0, %v236_v59  ;;  %v1517_v59 = vld [vmem:[%s2514_s4 + $0x8] sm:$0xff] }
 0x29a   :  { %1751 = vrcp.f32 %v295_v10  ;;  %v307_v16 = vand.u32 2147483648, %v295_v10  ;;  %vm301_vm11 = vweird.f32 %v295_v10  ;;  %v305_v17 = vand.u32 2147483647, %v295_v10  ;;  %1540 = vmatpush.msrb.mxu0 %v1517_v59 }
 0x29b   :  { %v238_v62 = vmul.f32 %v1748_v58, %v237_v60  ;;  %v1516_v60 = vld [vmem:[%s2514_s4] sm:$0xff] }
 0x29c   :  { %v308_v19 = vor.u32 1.1754944e-38, %v307_v16  ;;  %vm306_vm13 = vcmp.eq.f32.partialorder %v305_v17, 8.507059e+37  ;;  %1541 = vmatpush.msrb.mxu0 %v1516_v60 }
 0x29d   :  { %v239_v0 = vadd.f32 %v1748_v58, %v238_v62 }
 0x29f   :  { %v243_v3 = vsel %vm242_vm8, %v1748_v58, %v239_v0 }
 0x2a0   :  { %v248_v4 = vsel %vm245_vm9, %v247_v1, %v243_v3  ;;  %v1752_v11 = vpop.eup %1751 }
 0x2a1   :  { %v276_v5 = vmul.f32 %v274_v2, %v248_v4  ;;  %v297_v12 = vmul.f32 %v1752_v11, %v295_v10  ;;  %vm302_vm10 = vweird.f32 %v1752_v11 }
 0x2a2   :  { %vm303_vm12 = vmor %vm301_vm11, %vm302_vm10 }
 0x2a3   :  { %278 = vrot.lane.b32.xlu0 %v276_v5, %s1896_s26  ;;  %v298_v13 = vsub.f32 1.0, %v297_v12 }
 0x2a5   :  { %v299_v14 = vmul.f32 %v1752_v11, %v298_v13 }
 0x2a7   :  { %v300_v15 = vadd.f32 %v1752_v11, %v299_v14 }
 0x2a9   :  { %v304_v18 = vsel %vm303_vm12, %v1752_v11, %v300_v15 }
 0x2aa   :  { %v2098_v21 = vsel %vm306_vm13, %v308_v19, %v304_v18 }
 0x2ab   :  { %v323_v12 = vsub.f32 1.0, %v2098_v21  ;;  %v329_v14 = vmul.f32 %v2098_v21, %v2058_v40 }
 0x2f5   :  { %v314_v20 = vpop.permute.xlu0 %313 }
 0x2f6   :  { %v316_v22 = vmul.f32 %v314_v20, %v2098_v21 }
 0x2f8   :  { %318 = vrot.lane.b32.xlu2 %v316_v22, %s1896_s26 }
 0x315   :  { %v279_v37 = vpop.permute.xlu0 %278 }
 0x316   :  { %v281_v38 = vadd.f32 %v279_v37, %v265_v34 }
 0x318   :  { %1753 = vtanh.f32 %v281_v38 }
 0x319   :  { %1755 = vpow2.f32 %v1669_v53 }
 0x31e   :  { %v1754_v39 = vpop.eup %1753 }
 0x31f   :  { %285 = vrot.lane.b32.xlu2 %v1754_v39, %s1897_s29  ;;  %v1756_v55 = vpop.eup %1755 }
 0x320   :  { %v234_v57 = vadd.f32 1.0, %v1756_v55 }
 0x322   :  { %v261_v2 = vand.u32 2147483648, %v234_v57  ;;  %vm255_vm15 = vweird.f32 %v234_v57  ;;  %v259_v3 = vand.u32 2147483647, %v234_v57 }
 0x324   :  { %v262_v5 = vor.u32 1.1754944e-38, %v261_v2  ;;  %vm260_vm1 = vcmp.eq.f32.partialorder %v259_v3, 8.507059e+37 }
 0x352   :  { %v319_v56 = vpop.permute.xlu2 %318 }
 0x353   :  { %v321_v49 = vadd.f32 %v319_v56, %v77_v6 }
 0x355   :  { %1757 = vtanh.f32 %v321_v49 }
 0x356   :  { %1759 = vrcp.f32 %v234_v57 }
 0x35b   :  { %v1758_v58 = vpop.eup %1757 }
 0x35c   :  { %325 = vrot.lane.b32.xlu1 %v1758_v58, %s1897_s29  ;;  %v1760_v61 = vpop.eup %1759 }
 0x35d   :  { %v251_v62 = vmul.f32 %v1760_v61, %v234_v57  ;;  %vm256_vm14 = vweird.f32 %v1760_v61  ;;  %v80_v57 = vpop.f32.mrf.mxu0 }
 0x35e   :  { %vm257_vm0 = vmor %vm255_vm15, %vm256_vm14 }
 0x35f   :  { %v252_v63 = vsub.f32 1.0, %v251_v62 }
 0x361   :  { %v253_v0 = vmul.f32 %v1760_v61, %v252_v63 }
 0x363   :  { %v254_v1 = vadd.f32 %v1760_v61, %v253_v0 }
 0x365   :  { %v258_v4 = vsel %vm257_vm0, %v1760_v61, %v254_v1 }
 0x366   :  { %v263_v6 = vsel %vm260_vm1, %v262_v5, %v258_v4 }
 0x367   :  { %v283_v7 = vsub.f32 1.0, %v263_v6  ;;  %v289_v9 = vmul.f32 0.0, %v263_v6 }
 0x379   :  { %v286_v8 = vpop.permute.xlu2 %285 }
 0x37a   :  { %v288_v10 = vmul.f32 %v286_v8, %v283_v7 }
 0x37c   :  { %v2131_v11 = vadd.f32 %v289_v9, %v288_v10 }
 0x37e   :  { %1673 = vmatmul.msk.f32.vlgmr.msra.gmra.mxu3 %vm150_vm5, %v2131_v11  ;;  %1712 = vmatmul.msk.f32.vlgmr.msrb.gmra.mxu0 %vm150_vm5, %v2131_v11 }
 0x37f   :  { %741 = vmatpush.msra.mxu3 %v1963_v23 }
 0x381   :  { %742 = vmatpush.msra.mxu3 %v1969_v24 }
 0x383   :  { %743 = vmatpush.msra.mxu3 %v1988_v28 }
 0x385   :  { %744 = vmatpush.msra.mxu3 %v2017_v33 }
 0x3ce   :  { %v326_v13 = vpop.permute.xlu1 %325 }
 0x3cf   :  { %v328_v15 = vmul.f32 %v326_v13, %v323_v12 }
 0x3d1   :  { %v2144_v16 = vadd.f32 %v329_v14, %v328_v15 }
 0x3d3   :  { %332 = vrot.lane.b32.xlu0 %v2144_v16, %s1897_s29 }
 0x401   :  { %v396_v17 = vpop.f32.mrf.mxu3 }
 0x402   :  { %v446_v18 = vadd.f32 %v396_v17, %v2074_v46  ;;  %400 = vrot.lane.b32.xlu1 %v396_v17, %s1897_s29 }
 0x404   :  { %448 = vrot.lane.b32.xlu0 %v446_v18, %s1899_s15 }
 0x445   :  { %v333_v19 = vpop.permute.xlu0 %332 }
 0x446   :  { %1671 = vmatmul.msk.f32.vlgmr.msrb.gmra.mxu1 %vm150_vm5, %v333_v19  ;;  %1672 = vmatmul.msk.f32.vlgmr.msrb.gmra.mxu2 %vm150_vm5, %v333_v19 }
 0x447   :  { %698 = vmatpush.msrb.mxu1 %v1978_v26  ;;  %718 = vmatpush.msrb.mxu2 %v1983_v27 }
 0x449   :  { %699 = vmatpush.msrb.mxu1 %v1995_v29  ;;  %719 = vmatpush.msrb.mxu2 %v2000_v30 }
 0x44b   :  { %700 = vmatpush.msrb.mxu1 %v2007_v31  ;;  %720 = vmatpush.msrb.mxu2 %v2012_v32 }
 0x44d   :  { %701 = vmatpush.msrb.mxu1 %v2028_v35  ;;  %721 = vmatpush.msrb.mxu2 %v2035_v36 }
 0x474   :  { %v401_v40 = vpop.permute.xlu1 %400 }
 0x476   :  { %v449_v55 = vpop.permute.xlu0 %448 }
 0x4c3   :  { %v353_v20 = vpop.f32.mrf.mxu1 }
 0x4c4   :  { %v403_v21 = vadd.f32 %v401_v40, %v353_v20  ;;  %v486_v22 = vadd.f32 %v353_v20, %v2091_v50  ;;  %v466_v58 = vadd.f32 %v353_v20, %v80_v57 }
 0x4c6   :  { %v405_v25 = vadd.f32 %v403_v21, %v2091_v50  ;;  %488 = vrot.lane.b32.xlu2 %v486_v22, %s1896_s26  ;;  %v1676_v59 = vmul.f32 -1.442695, %v466_v58 }
 0x4c8   :  { %v1674_v34 = vmul.f32 -1.442695, %v405_v25 }
 0x4c9   :  { %v373_v10 = vpop.f32.mrf.mxu2 }
 0x4ca   :  { %1761 = vpow2.f32 %v1674_v34  ;;  %v445_v12 = vadd.f32 %v373_v10, %v2091_v50  ;;  %v404_v17 = vadd.f32 %v401_v40, %v373_v10 }
 0x4cc   :  { %v406_v18 = vadd.f32 %v404_v17, %v2091_v50 }
 0x4ce   :  { %v1675_v19 = vmul.f32 -1.442695, %v406_v18 }
 0x4d0   :  { %v1762_v37 = vpop.eup %1761 }
 0x4d1   :  { %v413_v38 = vadd.f32 1.0, %v1762_v37 }
 0x4d3   :  { %1763 = vrcp.f32 %v413_v38  ;;  %v426_v47 = vand.u32 2147483648, %v413_v38  ;;  %v424_v51 = vand.u32 2147483647, %v413_v38  ;;  %vm420_vm3 = vweird.f32 %v413_v38 }
 0x4d4   :  { %1765 = vpow2.f32 %v1676_v59 }
 0x4d5   :  { %v427_v53 = vor.u32 1.1754944e-38, %v426_v47  ;;  %vm425_vm6 = vcmp.eq.f32.partialorder %v424_v51, 8.507059e+37 }
 0x4d9   :  { %v1764_v39 = vpop.eup %1763 }
 0x4da   :  { %v416_v41 = vmul.f32 %v1764_v39, %v413_v38  ;;  %vm421_vm2 = vweird.f32 %v1764_v39  ;;  %v1766_v60 = vpop.eup %1765 }
 0x4db   :  { %vm422_vm4 = vmor %vm420_vm3, %vm421_vm2  ;;  %v470_v61 = vadd.f32 1.0, %v1766_v60 }
 0x4dc   :  { %v417_v45 = vsub.f32 1.0, %v416_v41 }
 0x4dd   :  { %1767 = vrcp.f32 %v470_v61  ;;  %v482_v3 = vand.u32 2147483648, %v470_v61  ;;  %vm476_vm8 = vweird.f32 %v470_v61  ;;  %v480_v4 = vand.u32 2147483647, %v470_v61 }
 0x4de   :  { %v418_v48 = vmul.f32 %v1764_v39, %v417_v45 }
 0x4df   :  { %v483_v6 = vor.u32 1.1754944e-38, %v482_v3  ;;  %vm481_vm10 = vcmp.eq.f32.partialorder %v480_v4, 8.507059e+37 }
 0x4e0   :  { %v419_v52 = vadd.f32 %v1764_v39, %v418_v48 }
 0x4e2   :  { %v423_v54 = vsel %vm422_vm4, %v1764_v39, %v419_v52 }
 0x4e3   :  { %v428_v56 = vsel %vm425_vm6, %v427_v53, %v423_v54  ;;  %v1768_v62 = vpop.eup %1767 }
 0x4e4   :  { %v451_v49 = vmul.f32 %v449_v55, %v428_v56  ;;  %v472_v63 = vmul.f32 %v1768_v62, %v470_v61  ;;  %vm477_vm7 = vweird.f32 %v1768_v62 }
 0x4e5   :  { %vm478_vm9 = vmor %vm476_vm8, %vm477_vm7 }
 0x4e6   :  { %453 = vrot.lane.b32.xlu2 %v451_v49, %s1896_s26  ;;  %v473_v0 = vsub.f32 1.0, %v472_v63 }
 0x4e8   :  { %v474_v1 = vmul.f32 %v1768_v62, %v473_v0 }
 0x4ea   :  { %v475_v2 = vadd.f32 %v1768_v62, %v474_v1 }
 0x4ec   :  { %v479_v5 = vsel %vm478_vm9, %v1768_v62, %v475_v2 }
 0x4ed   :  { %v484_v8 = vsel %vm481_vm10, %v483_v6, %v479_v5 }
 0x520   :  { %v489_v7 = vpop.permute.xlu2 %488 }
 0x521   :  { %v491_v9 = vmul.f32 %v489_v7, %v484_v8 }
 0x523   :  { %493 = vrot.lane.b32.xlu1 %v491_v9, %s1896_s26 }
 0x540   :  { %v454_v13 = vpop.permute.xlu2 %453 }
 0x541   :  { %v456_v14 = vadd.f32 %v454_v13, %v445_v12 }
 0x543   :  { %1769 = vtanh.f32 %v456_v14 }
 0x544   :  { %1771 = vpow2.f32 %v1675_v19 }
 0x549   :  { %v1770_v15 = vpop.eup %1769 }
 0x54a   :  { %460 = vrot.lane.b32.xlu1 %v1770_v15, %s1897_s29  ;;  %v1772_v20 = vpop.eup %1771 }
 0x54b   :  { %v414_v25 = vadd.f32 1.0, %v1772_v20 }
 0x54d   :  { %v441_v40 = vand.u32 2147483648, %v414_v25  ;;  %vm435_vm12 = vweird.f32 %v414_v25  ;;  %v439_v47 = vand.u32 2147483647, %v414_v25 }
 0x54f   :  { %v442_v51 = vor.u32 1.1754944e-38, %v441_v40  ;;  %vm440_vm14 = vcmp.eq.f32.partialorder %v439_v47, 8.507059e+37 }
 0x595   :  { %v494_v21 = vpop.permute.xlu1 %493 }
 0x596   :  { %v496_v22 = vadd.f32 %v494_v21, %v80_v57  ;;  %v498_v57 = vsub.f32 1.0, %v484_v8  ;;  %v83_v21 = vpop.f32.mrf.mxu0 }
 0x598   :  { %1773 = vtanh.f32 %v496_v22 }
 0x599   :  { %1775 = vrcp.f32 %v414_v25 }
 0x59e   :  { %v1774_v34 = vpop.eup %1773 }
 0x59f   :  { %500 = vrot.lane.b32.xlu0 %v1774_v34, %s1897_s29  ;;  %v1776_v37 = vpop.eup %1775 }
 0x5a0   :  { %v431_v38 = vmul.f32 %v1776_v37, %v414_v25  ;;  %vm436_vm11 = vweird.f32 %v1776_v37 }
 0x5a1   :  { %vm437_vm13 = vmor %vm435_vm12, %vm436_vm11 }
 0x5a2   :  { %v432_v39 = vsub.f32 1.0, %v431_v38 }
 0x5a4   :  { %v433_v41 = vmul.f32 %v1776_v37, %v432_v39 }
 0x5a6   :  { %v434_v45 = vadd.f32 %v1776_v37, %v433_v41 }
 0x5a8   :  { %v438_v48 = vsel %vm437_vm13, %v1776_v37, %v434_v45 }
 0x5a9   :  { %v443_v52 = vsel %vm440_vm14, %v442_v51, %v438_v48 }
 0x5aa   :  { %v458_v53 = vsub.f32 1.0, %v443_v52  ;;  %v464_v55 = vmul.f32 %v443_v52, %v2131_v11  ;;  %v504_v11 = vmul.f32 %v484_v8, %v2144_v16 }
 0x5bc   :  { %v461_v54 = vpop.permute.xlu1 %460 }
 0x5bd   :  { %v463_v56 = vmul.f32 %v461_v54, %v458_v53 }
 0x5bf   :  { %v2171_v49 = vadd.f32 %v464_v55, %v463_v56 }
 0x5c1   :  { %1679 = vmatmul.msk.f32.vlgmr.msrb.gmra.mxu3 %vm150_vm5, %v2171_v49  ;;  %1713 = vmatmul.msk.f32.gmra.mxu0 %vm150_vm5, %v2171_v49 }
 0x5c2   :  { %916 = vmatpush.msrb.mxu3 %v1963_v23 }
 0x5c4   :  { %917 = vmatpush.msrb.mxu3 %v1969_v24 }
 0x5c6   :  { %918 = vmatpush.msrb.mxu3 %v1988_v28 }
 0x5c8   :  { %919 = vmatpush.msrb.mxu3 %v2017_v33 }
 0x611   :  { %v501_v58 = vpop.permute.xlu0 %500 }
 0x612   :  { %v503_v59 = vmul.f32 %v501_v58, %v498_v57 }
 0x614   :  { %v2182_v60 = vadd.f32 %v504_v11, %v503_v59 }
 0x616   :  { %507 = vrot.lane.b32.xlu2 %v2182_v60, %s1897_s29 }
 0x644   :  { %v571_v61 = vpop.f32.mrf.mxu3 }
 0x645   :  { %v621_v62 = vadd.f32 %v571_v61, %v2074_v46  ;;  %575 = vrot.lane.b32.xlu0 %v571_v61, %s1897_s29 }
 0x647   :  { %623 = vrot.lane.b32.xlu2 %v621_v62, %s1899_s15 }
 0x670   :  { %v508_v63 = vpop.permute.xlu2 %507 }
 0x671   :  { %1677 = vmatmul.msk.f32.vlgmr.msra.gmra.mxu1 %vm150_vm5, %v508_v63  ;;  %1678 = vmatmul.msk.f32.vlgmr.msra.gmra.mxu2 %vm150_vm5, %v508_v63 }
 0x672   :  { %873 = vmatpush.msra.mxu1 %v1978_v26  ;;  %893 = vmatpush.msra.mxu2 %v1983_v27 }
 0x674   :  { %874 = vmatpush.msra.mxu1 %v1995_v29  ;;  %894 = vmatpush.msra.mxu2 %v2000_v30 }
 0x676   :  { %875 = vmatpush.msra.mxu1 %v2007_v31  ;;  %895 = vmatpush.msra.mxu2 %v2012_v32 }
 0x678   :  { %876 = vmatpush.msra.mxu1 %v2028_v35  ;;  %896 = vmatpush.msra.mxu2 %v2035_v36 }
 0x6a1   :  { %v624_v18 = vpop.permute.xlu2 %623 }
 0x6b7   :  { %v576_v16 = vpop.permute.xlu0 %575 }
 0x6ee   :  { %v528_v0 = vpop.f32.mrf.mxu1 }
 0x6ef   :  { %v578_v1 = vadd.f32 %v576_v16, %v528_v0  ;;  %v661_v2 = vadd.f32 %v528_v0, %v2091_v50  ;;  %v641_v22 = vadd.f32 %v528_v0, %v83_v21 }
 0x6f1   :  { %v580_v3 = vadd.f32 %v578_v1, %v2091_v50  ;;  %663 = vrot.lane.b32.xlu1 %v661_v2, %s1896_s26  ;;  %v1682_v25 = vmul.f32 -1.442695, %v641_v22 }
 0x6f3   :  { %v1680_v4 = vmul.f32 -1.442695, %v580_v3 }
 0x6f4   :  { %v548_v56 = vpop.f32.mrf.mxu2 }
 0x6f5   :  { %1777 = vpow2.f32 %v1680_v4  ;;  %v620_v57 = vadd.f32 %v548_v56, %v2091_v50  ;;  %v579_v61 = vadd.f32 %v576_v16, %v548_v56 }
 0x6f7   :  { %v581_v62 = vadd.f32 %v579_v61, %v2091_v50 }
 0x6f9   :  { %v1681_v63 = vmul.f32 -1.442695, %v581_v62 }
 0x6fb   :  { %v1778_v5 = vpop.eup %1777 }
 0x6fc   :  { %v588_v6 = vadd.f32 1.0, %v1778_v5 }
 0x6fe   :  { %1779 = vrcp.f32 %v588_v6  ;;  %v601_v10 = vand.u32 2147483648, %v588_v6  ;;  %v599_v13 = vand.u32 2147483647, %v588_v6  ;;  %vm595_vm0 = vweird.f32 %v588_v6 }
 0x6ff   :  { %1781 = vpow2.f32 %v1682_v25 }
 0x700   :  { %v602_v15 = vor.u32 1.1754944e-38, %v601_v10  ;;  %vm600_vm2 = vcmp.eq.f32.partialorder %v599_v13, 8.507059e+37 }
 0x704   :  { %v1780_v7 = vpop.eup %1779 }
 0x705   :  { %v591_v8 = vmul.f32 %v1780_v7, %v588_v6  ;;  %vm596_vm15 = vweird.f32 %v1780_v7  ;;  %v1782_v34 = vpop.eup %1781 }
 0x706   :  { %vm597_vm1 = vmor %vm595_vm0, %vm596_vm15  ;;  %v645_v37 = vadd.f32 1.0, %v1782_v34 }
 0x707   :  { %v592_v9 = vsub.f32 1.0, %v591_v8 }
 0x708   :  { %1783 = vrcp.f32 %v645_v37  ;;  %v657_v47 = vand.u32 2147483648, %v645_v37  ;;  %vm651_vm4 = vweird.f32 %v645_v37  ;;  %v655_v48 = vand.u32 2147483647, %v645_v37 }
 0x709   :  { %v593_v12 = vmul.f32 %v1780_v7, %v592_v9 }
 0x70a   :  { %v658_v52 = vor.u32 1.1754944e-38, %v657_v47  ;;  %vm656_vm7 = vcmp.eq.f32.partialorder %v655_v48, 8.507059e+37 }
 0x70b   :  { %v594_v14 = vadd.f32 %v1780_v7, %v593_v12 }
 0x70d   :  { %v598_v17 = vsel %vm597_vm1, %v1780_v7, %v594_v14 }
 0x70e   :  { %v603_v19 = vsel %vm600_vm2, %v602_v15, %v598_v17  ;;  %v1784_v38 = vpop.eup %1783 }
 0x70f   :  { %v626_v20 = vmul.f32 %v624_v18, %v603_v19  ;;  %v647_v39 = vmul.f32 %v1784_v38, %v645_v37  ;;  %vm652_vm3 = vweird.f32 %v1784_v38 }
 0x710   :  { %vm653_vm6 = vmor %vm651_vm4, %vm652_vm3 }
 0x711   :  { %628 = vrot.lane.b32.xlu1 %v626_v20, %s1896_s26  ;;  %v648_v41 = vsub.f32 1.0, %v647_v39 }
 0x713   :  { %v649_v45 = vmul.f32 %v1784_v38, %v648_v41 }
 0x715   :  { %v650_v40 = vadd.f32 %v1784_v38, %v649_v45 }
 0x717   :  { %v654_v51 = vsel %vm653_vm6, %v1784_v38, %v650_v40 }
 0x718   :  { %v659_v54 = vsel %vm656_vm7, %v658_v52, %v654_v51 }
 0x763   :  { %v664_v53 = vpop.permute.xlu1 %663 }
 0x764   :  { %v666_v55 = vmul.f32 %v664_v53, %v659_v54  ;;  %v86_v53 = vpop.f32.mrf.mxu0 }
 0x766   :  { %668 = vrot.lane.b32.xlu0 %v666_v55, %s1896_s26 }
 0x783   :  { %v629_v58 = vpop.permute.xlu1 %628 }
 0x784   :  { %v631_v11 = vadd.f32 %v629_v58, %v620_v57 }
 0x786   :  { %1785 = vtanh.f32 %v631_v11 }
 0x787   :  { %1787 = vpow2.f32 %v1681_v63 }
 0x78c   :  { %v1786_v59 = vpop.eup %1785 }
 0x78d   :  { %635 = vrot.lane.b32.xlu0 %v1786_v59, %s1897_s29  ;;  %v1788_v0 = vpop.eup %1787 }
 0x78e   :  { %v589_v3 = vadd.f32 1.0, %v1788_v0 }
 0x790   :  { %v616_v16 = vand.u32 2147483648, %v589_v3  ;;  %vm610_vm9 = vweird.f32 %v589_v3  ;;  %v614_v10 = vand.u32 2147483647, %v589_v3 }
 0x792   :  { %v617_v13 = vor.u32 1.1754944e-38, %v616_v16  ;;  %vm615_vm11 = vcmp.eq.f32.partialorder %v614_v10, 8.507059e+37 }
 0x7d8   :  { %v669_v1 = vpop.permute.xlu0 %668 }
 0x7d9   :  { %v671_v2 = vadd.f32 %v669_v1, %v83_v21  ;;  %v673_v21 = vsub.f32 1.0, %v659_v54 }
 0x7db   :  { %1789 = vtanh.f32 %v671_v2 }
 0x7dc   :  { %1791 = vrcp.f32 %v589_v3 }
 0x7e1   :  { %v1790_v4 = vpop.eup %1789 }
 0x7e2   :  { %675 = vrot.lane.b32.xlu2 %v1790_v4, %s1897_s29  ;;  %v1792_v5 = vpop.eup %1791 }
 0x7e3   :  { %v606_v6 = vmul.f32 %v1792_v5, %v589_v3  ;;  %vm611_vm8 = vweird.f32 %v1792_v5 }
 0x7e4   :  { %vm612_vm10 = vmor %vm610_vm9, %vm611_vm8 }
 0x7e5   :  { %v607_v7 = vsub.f32 1.0, %v606_v6 }
 0x7e7   :  { %v608_v8 = vmul.f32 %v1792_v5, %v607_v7 }
 0x7e9   :  { %v609_v9 = vadd.f32 %v1792_v5, %v608_v8 }
 0x7eb   :  { %v613_v12 = vsel %vm612_vm10, %v1792_v5, %v609_v9 }
 0x7ec   :  { %v618_v14 = vsel %vm615_vm11, %v617_v13, %v613_v12 }
 0x7ed   :  { %v633_v15 = vsub.f32 1.0, %v618_v14  ;;  %v639_v18 = vmul.f32 %v618_v14, %v2171_v49  ;;  %v679_v49 = vmul.f32 %v659_v54, %v2182_v60 }
 0x7ff   :  { %v636_v17 = vpop.permute.xlu0 %635 }
 0x800   :  { %v638_v19 = vmul.f32 %v636_v17, %v633_v15 }
 0x802   :  { %v2209_v20 = vadd.f32 %v639_v18, %v638_v19 }
 0x804   :  { %1685 = vmatmul.msk.f32.vlgmr.msra.gmra.mxu3 %vm150_vm5, %v2209_v20  ;;  %1714 = vmatmul.msk.f32.gmra.mxu0 %vm150_vm5, %v2209_v20 }
 0x805   :  { %1091 = vmatpush.msra.mxu3 %v1963_v23 }
 0x807   :  { %1092 = vmatpush.msra.mxu3 %v1969_v24 }
 0x809   :  { %1093 = vmatpush.msra.mxu3 %v1988_v28 }
 0x80b   :  { %1094 = vmatpush.msra.mxu3 %v2017_v33 }
 0x83c   :  { %v676_v22 = vpop.permute.xlu2 %675 }
 0x83d   :  { %v678_v25 = vmul.f32 %v676_v22, %v673_v21 }
 0x83f   :  { %v2220_v34 = vadd.f32 %v679_v49, %v678_v25 }
 0x841   :  { %682 = vrot.lane.b32.xlu1 %v2220_v34, %s1897_s29 }
 0x887   :  { %v746_v37 = vpop.f32.mrf.mxu3 }
 0x888   :  { %v796_v38 = vadd.f32 %v746_v37, %v2074_v46  ;;  %750 = vrot.lane.b32.xlu2 %v746_v37, %s1897_s29 }
 0x88a   :  { %798 = vrot.lane.b32.xlu1 %v796_v38, %s1899_s15 }
 0x8b3   :  { %v683_v23 = vpop.permute.xlu1 %682 }
 0x8b4   :  { %1683 = vmatmul.msk.f32.vlgmr.msrb.gmra.mxu1 %vm150_vm5, %v683_v23  ;;  %1684 = vmatmul.msk.f32.vlgmr.msrb.gmra.mxu2 %vm150_vm5, %v683_v23 }
 0x8b5   :  { %1048 = vmatpush.msrb.mxu1 %v1978_v26  ;;  %1068 = vmatpush.msrb.mxu2 %v1983_v27 }
 0x8b7   :  { %1049 = vmatpush.msrb.mxu1 %v1995_v29  ;;  %1069 = vmatpush.msrb.mxu2 %v2000_v30 }
 0x8b9   :  { %1050 = vmatpush.msrb.mxu1 %v2007_v31  ;;  %1070 = vmatpush.msrb.mxu2 %v2012_v32 }
 0x8bb   :  { %1051 = vmatpush.msrb.mxu1 %v2028_v35  ;;  %1071 = vmatpush.msrb.mxu2 %v2035_v36 }
 0x8e2   :  { %v751_v24 = vpop.permute.xlu2 %750 }
 0x8fc   :  { %v799_v48 = vpop.permute.xlu1 %798 }
 0x931   :  { %v703_v28 = vpop.f32.mrf.mxu1 }
 0x932   :  { %v753_v33 = vadd.f32 %v751_v24, %v703_v28  ;;  %v836_v60 = vadd.f32 %v703_v28, %v2091_v50  ;;  %v816_v54 = vadd.f32 %v703_v28, %v86_v53 }
 0x934   :  { %v755_v26 = vadd.f32 %v753_v33, %v2091_v50  ;;  %838 = vrot.lane.b32.xlu0 %v836_v60, %s1896_s26  ;;  %v1688_v55 = vmul.f32 -1.442695, %v816_v54  ;;  %v2308_v54 = vld [vmem:[%s2513_s2 + $0x28] sm:$0xff] }
 0x936   :  { %v1686_v27 = vmul.f32 -1.442695, %v755_v26 }
 0x937   :  { %v723_v6 = vpop.f32.mrf.mxu2 }
 0x938   :  { %1793 = vpow2.f32 %v1686_v27  ;;  %v795_v7 = vadd.f32 %v723_v6, %v2091_v50  ;;  %v754_v10 = vadd.f32 %v751_v24, %v723_v6 }
 0x93a   :  { %v756_v12 = vadd.f32 %v754_v10, %v2091_v50 }
 0x93c   :  { %v1687_v13 = vmul.f32 -1.442695, %v756_v12 }
 0x93e   :  { %v1794_v29 = vpop.eup %1793 }
 0x93f   :  { %v763_v30 = vadd.f32 1.0, %v1794_v29 }
 0x941   :  { %1795 = vrcp.f32 %v763_v30  ;;  %v776_v35 = vand.u32 2147483648, %v763_v30  ;;  %v774_v36 = vand.u32 2147483647, %v763_v30  ;;  %vm770_vm13 = vweird.f32 %v763_v30 }
 0x942   :  { %1797 = vpow2.f32 %v1688_v55  ;;  %v2314_v55 = vld [vmem:[%s2513_s2 + $0x10] sm:$0xff] }
 0x943   :  { %v777_v40 = vor.u32 1.1754944e-38, %v776_v35  ;;  %vm775_vm15 = vcmp.eq.f32.partialorder %v774_v36, 8.507059e+37 }
 0x947   :  { %v1796_v31 = vpop.eup %1795 }
 0x948   :  { %v766_v32 = vmul.f32 %v1796_v31, %v763_v30  ;;  %vm771_vm12 = vweird.f32 %v1796_v31  ;;  %v1798_v56 = vpop.eup %1797 }
 0x949   :  { %vm772_vm14 = vmor %vm770_vm13, %vm771_vm12  ;;  %v820_v57 = vadd.f32 1.0, %v1798_v56  ;;  %v2320_v56 = vld [vmem:[%s2513_s2 + $0x18] sm:$0xff] }
 0x94a   :  { %v767_v39 = vsub.f32 1.0, %v766_v32  ;;  %v2268_v32 = vld [vmem:[%s2512_s3 + $0x8] sm:$0xff] }
 0x94b   :  { %1799 = vrcp.f32 %v820_v57  ;;  %v832_v63 = vand.u32 2147483648, %v820_v57  ;;  %vm826_vm1 = vweird.f32 %v820_v57  ;;  %v830_v0 = vand.u32 2147483647, %v820_v57 }
 0x94c   :  { %v768_v41 = vmul.f32 %v1796_v31, %v767_v39  ;;  %v2274_v39 = vld [vmem:[%s2512_s3] sm:$0xff] }
 0x94d   :  { %v833_v2 = vor.u32 1.1754944e-38, %v832_v63  ;;  %vm831_vm3 = vcmp.eq.f32.partialorder %v830_v0, 8.507059e+37 }
 0x94e   :  { %v769_v45 = vadd.f32 %v1796_v31, %v768_v41 }
 0x950   :  { %v773_v47 = vsel %vm772_vm14, %v1796_v31, %v769_v45  ;;  %v2256_v31 = vld [vmem:[%s2512_s3 + $0x18] sm:$0xff] }
 0x951   :  { %v778_v51 = vsel %vm775_vm15, %v777_v40, %v773_v47  ;;  %v1800_v58 = vpop.eup %1799 }
 0x952   :  { %v801_v52 = vmul.f32 %v799_v48, %v778_v51  ;;  %v822_v11 = vmul.f32 %v1800_v58, %v820_v57  ;;  %vm827_vm0 = vweird.f32 %v1800_v58  ;;  %v2326_v57 = vld [vmem:[%s2513_s2] sm:$0xff] }
 0x953   :  { %vm828_vm2 = vmor %vm826_vm1, %vm827_vm0 }
 0x954   :  { %803 = vrot.lane.b32.xlu0 %v801_v52, %s1896_s26  ;;  %v823_v59 = vsub.f32 1.0, %v822_v11  ;;  %v2296_v52 = vld [vmem:[%s2513_s2 + $0x38] sm:$0xff] }
 0x956   :  { %v824_v61 = vmul.f32 %v1800_v58, %v823_v59 }
 0x958   :  { %v825_v62 = vadd.f32 %v1800_v58, %v824_v61 }
 0x95a   :  { %v829_v1 = vsel %vm828_vm2, %v1800_v58, %v825_v62  ;;  %v2332_v58 = vld [vmem:[%s2513_s2 + $0x8] sm:$0xff] }
 0x95b   :  { %v834_v4 = vsel %vm831_vm3, %v833_v2, %v829_v1 }
 0x95c   :  { %v848_v35 = vsub.f32 1.0, %v834_v4  ;;  %v854_v36 = vmul.f32 %v834_v4, %v2220_v34  ;;  %v2290_v34 = vld [vmem:[%s2513_s2 + $0x30] sm:$0xff] }
 0x9a6   :  { %v839_v3 = vpop.permute.xlu0 %838 }
 0x9a7   :  { %v841_v5 = vmul.f32 %v839_v3, %v834_v4 }
 0x9a9   :  { %843 = vrot.lane.b32.xlu2 %v841_v5, %s1896_s26 }
 0x9c6   :  { %v804_v8 = vpop.permute.xlu0 %803 }
 0x9c7   :  { %v806_v9 = vadd.f32 %v804_v8, %v795_v7 }
 0x9c9   :  { %1801 = vtanh.f32 %v806_v9 }
 0x9ca   :  { %1803 = vpow2.f32 %v1687_v13 }
 0x9cf   :  { %v1802_v16 = vpop.eup %1801 }
 0x9d0   :  { %810 = vrot.lane.b32.xlu2 %v1802_v16, %s1897_s29  ;;  %v1804_v14 = vpop.eup %1803 }
 0x9d1   :  { %v764_v18 = vadd.f32 1.0, %v1804_v14 }
 0x9d3   :  { %v791_v38 = vand.u32 2147483648, %v764_v18  ;;  %vm785_vm6 = vweird.f32 %v764_v18  ;;  %v789_v23 = vand.u32 2147483647, %v764_v18 }
 0x9d5   :  { %v792_v28 = vor.u32 1.1754944e-38, %v791_v38  ;;  %vm790_vm8 = vcmp.eq.f32.partialorder %v789_v23, 8.507059e+37 }
 0xa03   :  { %v844_v15 = vpop.permute.xlu2 %843 }
 0xa04   :  { %v846_v17 = vadd.f32 %v844_v15, %v86_v53  ;;  %v2302_v53 = vld [vmem:[%s2513_s2 + $0x20] sm:$0xff] }
 0xa06   :  { %1805 = vtanh.f32 %v846_v17 }
 0xa07   :  { %1807 = vrcp.f32 %v764_v18 }
 0xa0c   :  { %v1806_v19 = vpop.eup %1805 }
 0xa0d   :  { %850 = vrot.lane.b32.xlu1 %v1806_v19, %s1897_s29  ;;  %v1808_v21 = vpop.eup %1807 }
 0xa0e   :  { %v781_v22 = vmul.f32 %v1808_v21, %v764_v18  ;;  %vm786_vm4 = vweird.f32 %v1808_v21 }
 0xa0f   :  { %vm787_vm7 = vmor %vm785_vm6, %vm786_vm4 }
 0xa10   :  { %v782_v49 = vsub.f32 1.0, %v781_v22 }
 0xa12   :  { %v783_v25 = vmul.f32 %v1808_v21, %v782_v49 }
 0xa14   :  { %v784_v37 = vadd.f32 %v1808_v21, %v783_v25 }
 0xa16   :  { %v788_v24 = vsel %vm787_vm7, %v1808_v21, %v784_v37 }
 0xa17   :  { %v793_v33 = vsel %vm790_vm8, %v792_v28, %v788_v24 }
 0xa18   :  { %v808_v60 = vsub.f32 1.0, %v793_v33  ;;  %v814_v27 = vmul.f32 %v793_v33, %v2209_v20  ;;  %v2262_v20 = vld [vmem:[%s2512_s3 + $0x10] sm:$0xff] }
 0xa2a   :  { %v811_v26 = vpop.permute.xlu2 %810 }
 0xa2b   :  { %v813_v29 = vmul.f32 %v811_v26, %v808_v60 }
 0xa2d   :  { %v2247_v30 = vadd.f32 %v814_v27, %v813_v29 }
 0xa2f   :  { %1691 = vmatmul.msk.f32.vlgmr.msrb.gmra.mxu3 %vm150_vm5, %v2247_v30  ;;  %1715 = vmatmul.msk.f32.gmra.mxu0 %vm150_vm5, %v2247_v30 }
 0xa30   :  { %1266 = vmatpush.msrb.mxu3 %v2256_v31 }
 0xa32   :  { %1267 = vmatpush.msrb.mxu3 %v2262_v20 }
 0xa34   :  { %1268 = vmatpush.msrb.mxu3 %v2268_v32 }
 0xa36   :  { %1269 = vmatpush.msrb.mxu3 %v2274_v39 }
 0xa7f   :  { %v851_v41 = vpop.permute.xlu1 %850 }
 0xa80   :  { %v853_v45 = vmul.f32 %v851_v41, %v848_v35 }
 0xa82   :  { %v2278_v40 = vadd.f32 %v854_v36, %v853_v45 }
 0xa84   :  { %857 = vrot.lane.b32.xlu0 %v2278_v40, %s1897_s29 }
 0xab2   :  { %v921_v47 = vpop.f32.mrf.mxu3 }
 0xab3   :  { %v971_v48 = vadd.f32 %v921_v47, %v2074_v46  ;;  %925 = vrot.lane.b32.xlu1 %v921_v47, %s1897_s29 }
 0xab5   :  { %973 = vrot.lane.b32.xlu2 %v971_v48, %s1899_s15 }
 0xaf6   :  { %v858_v51 = vpop.permute.xlu0 %857 }
 0xaf7   :  { %1689 = vmatmul.msk.f32.vlgmr.msra.gmra.mxu1 %vm150_vm5, %v858_v51  ;;  %1690 = vmatmul.msk.f32.vlgmr.msra.gmra.mxu2 %vm150_vm5, %v858_v51 }
 0xaf8   :  { %1223 = vmatpush.msra.mxu1 %v2290_v34  ;;  %1243 = vmatpush.msra.mxu2 %v2296_v52 }
 0xafa   :  { %1224 = vmatpush.msra.mxu1 %v2302_v53  ;;  %1244 = vmatpush.msra.mxu2 %v2308_v54 }
 0xafc   :  { %1225 = vmatpush.msra.mxu1 %v2314_v55  ;;  %1245 = vmatpush.msra.mxu2 %v2320_v56 }
 0xafe   :  { %1226 = vmatpush.msra.mxu1 %v2326_v57  ;;  %1246 = vmatpush.msra.mxu2 %v2332_v58 }
 0xb0f   :  { %v974_v12 = vpop.permute.xlu2 %973 }
 0xb25   :  { %v926_v11 = vpop.permute.xlu1 %925 }
 0xb74   :  { %v878_v59 = vpop.f32.mrf.mxu1 }
 0xb75   :  { %v928_v61 = vadd.f32 %v926_v11, %v878_v59  ;;  %v1011_v62 = vadd.f32 %v878_v59, %v2091_v50  ;;  %v991_v15 = vadd.f32 %v878_v59, %v2068_v42 }
 0xb77   :  { %v930_v63 = vadd.f32 %v928_v61, %v2091_v50  ;;  %1013 = vrot.lane.b32.xlu0 %v1011_v62, %s1896_s26  ;;  %v1694_v17 = vmul.f32 -1.442695, %v991_v15 }
 0xb79   :  { %v1692_v0 = vmul.f32 -1.442695, %v930_v63 }
 0xb7a   :  { %v898_v27 = vpop.f32.mrf.mxu2 }
 0xb7b   :  { %1809 = vpow2.f32 %v1692_v0  ;;  %v970_v29 = vadd.f32 %v898_v27, %v2091_v50  ;;  %v929_v48 = vadd.f32 %v926_v11, %v898_v27 }
 0xb7d   :  { %v931_v59 = vadd.f32 %v929_v48, %v2091_v50 }
 0xb7f   :  { %v1693_v61 = vmul.f32 -1.442695, %v931_v59 }
 0xb81   :  { %v1810_v1 = vpop.eup %1809 }
 0xb82   :  { %v938_v2 = vadd.f32 1.0, %v1810_v1 }
 0xb84   :  { %1811 = vrcp.f32 %v938_v2  ;;  %v951_v6 = vand.u32 2147483648, %v938_v2  ;;  %v949_v8 = vand.u32 2147483647, %v938_v2  ;;  %vm945_vm10 = vweird.f32 %v938_v2 }
 0xb85   :  { %1813 = vpow2.f32 %v1694_v17 }
 0xb86   :  { %v952_v16 = vor.u32 1.1754944e-38, %v951_v6  ;;  %vm950_vm12 = vcmp.eq.f32.partialorder %v949_v8, 8.507059e+37 }
 0xb8a   :  { %v1812_v3 = vpop.eup %1811 }
 0xb8b   :  { %v941_v4 = vmul.f32 %v1812_v3, %v938_v2  ;;  %vm946_vm9 = vweird.f32 %v1812_v3  ;;  %v1814_v18 = vpop.eup %1813 }
 0xb8c   :  { %vm947_vm11 = vmor %vm945_vm10, %vm946_vm9  ;;  %v995_v19 = vadd.f32 1.0, %v1814_v18 }
 0xb8d   :  { %v942_v5 = vsub.f32 1.0, %v941_v4 }
 0xb8e   :  { %1815 = vrcp.f32 %v995_v19  ;;  %v1007_v38 = vand.u32 2147483648, %v995_v19  ;;  %vm1001_vm14 = vweird.f32 %v995_v19  ;;  %v1005_v23 = vand.u32 2147483647, %v995_v19 }
 0xb8f   :  { %v943_v7 = vmul.f32 %v1812_v3, %v942_v5 }
 0xb90   :  { %v1008_v28 = vor.u32 1.1754944e-38, %v1007_v38  ;;  %vm1006_vm0 = vcmp.eq.f32.partialorder %v1005_v23, 8.507059e+37 }
 0xb91   :  { %v944_v9 = vadd.f32 %v1812_v3, %v943_v7 }
 0xb93   :  { %v948_v10 = vsel %vm947_vm11, %v1812_v3, %v944_v9 }
 0xb94   :  { %v953_v13 = vsel %vm950_vm12, %v952_v16, %v948_v10  ;;  %v1816_v21 = vpop.eup %1815 }
 0xb95   :  { %v976_v14 = vmul.f32 %v974_v12, %v953_v13  ;;  %v997_v22 = vmul.f32 %v1816_v21, %v995_v19  ;;  %vm1002_vm13 = vweird.f32 %v1816_v21 }
 0xb96   :  { %vm1003_vm15 = vmor %vm1001_vm14, %vm1002_vm13 }
 0xb97   :  { %978 = vrot.lane.b32.xlu1 %v976_v14, %s1896_s26  ;;  %v998_v49 = vsub.f32 1.0, %v997_v22 }
 0xb99   :  { %v999_v25 = vmul.f32 %v1816_v21, %v998_v49 }
 0xb9b   :  { %v1000_v37 = vadd.f32 %v1816_v21, %v999_v25 }
 0xb9d   :  { %v1004_v24 = vsel %vm1003_vm15, %v1816_v21, %v1000_v37 }
 0xb9e   :  { %v1009_v60 = vsel %vm1006_vm0, %v1008_v28, %v1004_v24 }
 0xb9f   :  { %v1023_v13 = vsub.f32 1.0, %v1009_v60 }
 0xbe9   :  { %v1014_v33 = vpop.permute.xlu0 %1013 }
 0xbea   :  { %v1016_v26 = vmul.f32 %v1014_v33, %v1009_v60 }
 0xbec   :  { %1018 = vrot.lane.b32.xlu2 %v1016_v26, %s1896_s26 }
 0xc09   :  { %v979_v35 = vpop.permute.xlu1 %978 }
 0xc0a   :  { %v981_v41 = vadd.f32 %v979_v35, %v970_v29 }
 0xc0c   :  { %1817 = vtanh.f32 %v981_v41 }
 0xc12   :  { %v1818_v36 = vpop.eup %1817 }
 0xc13   :  { %985 = vrot.lane.b32.xlu0 %v1818_v36, %s1897_s29 }
 0xc46   :  { %v1019_v45 = vpop.permute.xlu2 %1018 }
 0xc47   :  { %v1021_v47 = vadd.f32 %v1019_v45, %v2068_v42 }
 0xc49   :  { %1819 = vtanh.f32 %v1021_v47 }
 0xc4a   :  { %1821 = vpow2.f32 %v1693_v61 }
 0xc4f   :  { %v1820_v51 = vpop.eup %1819 }
 0xc50   :  { %1025 = vrot.lane.b32.xlu1 %v1820_v51, %s1897_s29  ;;  %v1822_v62 = vpop.eup %1821 }
 0xc51   :  { %v939_v63 = vadd.f32 1.0, %v1822_v62 }
 0xc53   :  { %1823 = vrcp.f32 %v939_v63  ;;  %v966_v5 = vand.u32 2147483648, %v939_v63  ;;  %vm960_vm2 = vweird.f32 %v939_v63  ;;  %v964_v42 = vand.u32 2147483647, %v939_v63 }
 0xc55   :  { %v967_v6 = vor.u32 1.1754944e-38, %v966_v5  ;;  %vm965_vm4 = vcmp.eq.f32.partialorder %v964_v42, 8.507059e+37 }
 0xc59   :  { %v1824_v0 = vpop.eup %1823 }
 0xc5a   :  { %v956_v1 = vmul.f32 %v1824_v0, %v939_v63  ;;  %vm961_vm1 = vweird.f32 %v1824_v0 }
 0xc5b   :  { %vm962_vm3 = vmor %vm960_vm2, %vm961_vm1 }
 0xc5c   :  { %v957_v2 = vsub.f32 1.0, %v956_v1 }
 0xc5e   :  { %v958_v3 = vmul.f32 %v1824_v0, %v957_v2 }
 0xc60   :  { %v959_v4 = vadd.f32 %v1824_v0, %v958_v3 }
 0xc62   :  { %v963_v11 = vsel %vm962_vm3, %v1824_v0, %v959_v4 }
 0xc63   :  { %v968_v7 = vsel %vm965_vm4, %v967_v6, %v963_v11 }
 0xc64   :  { %v983_v8 = vsub.f32 1.0, %v968_v7  ;;  %v989_v16 = vmul.f32 %v968_v7, %v2247_v30  ;;  %v1029_v30 = vmul.f32 %v1009_v60, %v2278_v40 }
 0xc85   :  { %v986_v9 = vpop.permute.xlu0 %985 }
 0xc86   :  { %v988_v10 = vmul.f32 %v986_v9, %v983_v8 }
 0xc88   :  { %v2347_v12 = vadd.f32 %v989_v16, %v988_v10 }
 0xc8a   :  { %1697 = vmatmul.msk.f32.vlgmr.msra.gmra.mxu3 %vm150_vm5, %v2347_v12  ;;  %1716 = vmatmul.msk.f32.gmra.mxu0 %vm150_vm5, %v2347_v12 }
 0xc8b   :  { %1441 = vmatpush.msra.mxu3 %v2256_v31 }
 0xc8d   :  { %1442 = vmatpush.msra.mxu3 %v2262_v20 }
 0xc8f   :  { %1443 = vmatpush.msra.mxu3 %v2268_v32 }
 0xc91   :  { %1444 = vmatpush.msra.mxu3 %v2274_v39 }
 0xcc2   :  { %v1026_v14 = vpop.permute.xlu1 %1025 }
 0xcc3   :  { %v1028_v15 = vmul.f32 %v1026_v14, %v1023_v13 }
 0xcc5   :  { %v2358_v17 = vadd.f32 %v1029_v30, %v1028_v15 }
 0xcc7   :  { %1032 = vrot.lane.b32.xlu2 %v2358_v17, %s1897_s29 }
 0xd0d   :  { %v1096_v18 = vpop.f32.mrf.mxu3 }
 0xd0e   :  { %v1146_v19 = vadd.f32 %v1096_v18, %v2074_v46  ;;  %1100 = vrot.lane.b32.xlu0 %v1096_v18, %s1897_s29 }
 0xd10   :  { %1148 = vrot.lane.b32.xlu1 %v1146_v19, %s1899_s15 }
 0xd21   :  { %v1033_v31 = vpop.permute.xlu2 %1032 }
 0xd22   :  { %1695 = vmatmul.msk.f32.vlgmr.msrb.gmra.mxu1 %vm150_vm5, %v1033_v31  ;;  %1696 = vmatmul.msk.f32.vlgmr.msrb.gmra.mxu2 %vm150_vm5, %v1033_v31 }
 0xd23   :  { %1398 = vmatpush.msrb.mxu1 %v2290_v34  ;;  %1418 = vmatpush.msrb.mxu2 %v2296_v52 }
 0xd25   :  { %1399 = vmatpush.msrb.mxu1 %v2302_v53  ;;  %1419 = vmatpush.msrb.mxu2 %v2308_v54 }
 0xd27   :  { %1400 = vmatpush.msrb.mxu1 %v2314_v55  ;;  %1420 = vmatpush.msrb.mxu2 %v2320_v56 }
 0xd29   :  { %1401 = vmatpush.msrb.mxu1 %v2326_v57  ;;  %1421 = vmatpush.msrb.mxu2 %v2332_v58 }
 0xd80   :  { %v1101_v20 = vpop.permute.xlu0 %1100 }
 0xd82   :  { %v1149_v38 = vpop.permute.xlu1 %1148 }
 0xd9f   :  { %v1053_v32 = vpop.f32.mrf.mxu1 }
 0xda0   :  { %v1103_v39 = vadd.f32 %v1101_v20, %v1053_v32  ;;  %v1186_v40 = vadd.f32 %v1053_v32, %v2091_v50  ;;  %v1166_v28 = vadd.f32 %v1053_v32, %v2070_v43 }
 0xda2   :  { %v1105_v34 = vadd.f32 %v1103_v39, %v2091_v50  ;;  %1188 = vrot.lane.b32.xlu2 %v1186_v40, %s1896_s26  ;;  %v1700_v33 = vmul.f32 -1.442695, %v1166_v28 }
 0xda4   :  { %v1698_v52 = vmul.f32 -1.442695, %v1105_v34 }
 0xda5   :  { %v1073_v63 = vpop.f32.mrf.mxu2 }
 0xda6   :  { %1825 = vpow2.f32 %v1698_v52  ;;  %v1145_v0 = vadd.f32 %v1073_v63, %v2091_v50  ;;  %v1104_v4 = vadd.f32 %v1101_v20, %v1073_v63 }
 0xda8   :  { %v1106_v5 = vadd.f32 %v1104_v4, %v2091_v50 }
 0xdaa   :  { %v1699_v42 = vmul.f32 -1.442695, %v1106_v5 }
 0xdac   :  { %v1826_v53 = vpop.eup %1825 }
 0xdad   :  { %v1113_v54 = vadd.f32 1.0, %v1826_v53 }
 0xdaf   :  { %1827 = vrcp.f32 %v1113_v54  ;;  %v1126_v57 = vand.u32 2147483648, %v1113_v54  ;;  %v1124_v58 = vand.u32 2147483647, %v1113_v54  ;;  %vm1120_vm7 = vweird.f32 %v1113_v54 }
 0xdb0   :  { %1829 = vpow2.f32 %v1700_v33 }
 0xdb1   :  { %v1127_v25 = vor.u32 1.1754944e-38, %v1126_v57  ;;  %vm1125_vm9 = vcmp.eq.f32.partialorder %v1124_v58, 8.507059e+37 }
 0xdb5   :  { %v1828_v55 = vpop.eup %1827 }
 0xdb6   :  { %v1116_v56 = vmul.f32 %v1828_v55, %v1113_v54  ;;  %vm1121_vm6 = vweird.f32 %v1828_v55  ;;  %v1830_v60 = vpop.eup %1829 }
 0xdb7   :  { %vm1122_vm8 = vmor %vm1120_vm7, %vm1121_vm6  ;;  %v1170_v26 = vadd.f32 1.0, %v1830_v60 }
 0xdb8   :  { %v1117_v21 = vsub.f32 1.0, %v1116_v56 }
 0xdb9   :  { %1831 = vrcp.f32 %v1170_v26  ;;  %v1182_v45 = vand.u32 2147483648, %v1170_v26  ;;  %vm1176_vm11 = vweird.f32 %v1170_v26  ;;  %v1180_v47 = vand.u32 2147483647, %v1170_v26 }
 0xdba   :  { %v1118_v22 = vmul.f32 %v1828_v55, %v1117_v21 }
 0xdbb   :  { %v1183_v51 = vor.u32 1.1754944e-38, %v1182_v45  ;;  %vm1181_vm13 = vcmp.eq.f32.partialorder %v1180_v47, 8.507059e+37 }
 0xdbc   :  { %v1119_v49 = vadd.f32 %v1828_v55, %v1118_v22 }
 0xdbe   :  { %v1123_v37 = vsel %vm1122_vm8, %v1828_v55, %v1119_v49 }
 0xdbf   :  { %v1128_v23 = vsel %vm1125_vm9, %v1127_v25, %v1123_v37  ;;  %v1832_v27 = vpop.eup %1831 }
 0xdc0   :  { %v1151_v24 = vmul.f32 %v1149_v38, %v1128_v23  ;;  %v1172_v29 = vmul.f32 %v1832_v27, %v1170_v26  ;;  %vm1177_vm10 = vweird.f32 %v1832_v27 }
 0xdc1   :  { %vm1178_vm12 = vmor %vm1176_vm11, %vm1177_vm10 }
 0xdc2   :  { %1153 = vrot.lane.b32.xlu0 %v1151_v24, %s1896_s26  ;;  %v1173_v35 = vsub.f32 1.0, %v1172_v29 }
 0xdc4   :  { %v1174_v41 = vmul.f32 %v1832_v27, %v1173_v35 }
 0xdc6   :  { %v1175_v36 = vadd.f32 %v1832_v27, %v1174_v41 }
 0xdc8   :  { %v1179_v48 = vsel %vm1178_vm12, %v1832_v27, %v1175_v36 }
 0xdc9   :  { %v1184_v61 = vsel %vm1181_vm13, %v1183_v51, %v1179_v48 }
 0xdca   :  { %v1198_v52 = vsub.f32 1.0, %v1184_v61  ;;  %v1204_v54 = vmul.f32 %v1184_v61, %v2358_v17 }
 0xdfc   :  { %v1189_v59 = vpop.permute.xlu2 %1188 }
 0xdfd   :  { %v1191_v62 = vmul.f32 %v1189_v59, %v1184_v61 }
 0xdff   :  { %1193 = vrot.lane.b32.xlu1 %v1191_v62, %s1896_s26 }
 0xe34   :  { %v1154_v1 = vpop.permute.xlu0 %1153 }
 0xe35   :  { %v1156_v2 = vadd.f32 %v1154_v1, %v1145_v0 }
 0xe37   :  { %1833 = vtanh.f32 %v1156_v2 }
 0xe38   :  { %1835 = vpow2.f32 %v1699_v42 }
 0xe3d   :  { %v1834_v3 = vpop.eup %1833 }
 0xe3e   :  { %1160 = vrot.lane.b32.xlu2 %v1834_v3, %s1897_s29  ;;  %v1836_v11 = vpop.eup %1835 }
 0xe3f   :  { %v1114_v8 = vadd.f32 1.0, %v1836_v11 }
 0xe41   :  { %v1141_v15 = vand.u32 2147483648, %v1114_v8  ;;  %vm1135_vm15 = vweird.f32 %v1114_v8  ;;  %v1139_v18 = vand.u32 2147483647, %v1114_v8 }
 0xe43   :  { %v1142_v31 = vor.u32 1.1754944e-38, %v1141_v15  ;;  %vm1140_vm1 = vcmp.eq.f32.partialorder %v1139_v18, 8.507059e+37 }
 0xe71   :  { %v1194_v6 = vpop.permute.xlu1 %1193 }
 0xe72   :  { %v1196_v7 = vadd.f32 %v1194_v6, %v2070_v43 }
 0xe74   :  { %1837 = vtanh.f32 %v1196_v7 }
 0xe75   :  { %1839 = vrcp.f32 %v1114_v8 }
 0xe7a   :  { %v1838_v9 = vpop.eup %1837 }
 0xe7b   :  { %1200 = vrot.lane.b32.xlu0 %v1838_v9, %s1897_s29  ;;  %v1840_v16 = vpop.eup %1839 }
 0xe7c   :  { %v1131_v10 = vmul.f32 %v1840_v16, %v1114_v8  ;;  %vm1136_vm14 = vweird.f32 %v1840_v16 }
 0xe7d   :  { %vm1137_vm0 = vmor %vm1135_vm15, %vm1136_vm14 }
 0xe7e   :  { %v1132_v13 = vsub.f32 1.0, %v1131_v10 }
 0xe80   :  { %v1133_v14 = vmul.f32 %v1840_v16, %v1132_v13 }
 0xe82   :  { %v1134_v30 = vadd.f32 %v1840_v16, %v1133_v14 }
 0xe84   :  { %v1138_v19 = vsel %vm1137_vm0, %v1840_v16, %v1134_v30 }
 0xe85   :  { %v1143_v43 = vsel %vm1140_vm1, %v1142_v31, %v1138_v19 }
 0xe86   :  { %v1158_v20 = vsub.f32 1.0, %v1143_v43  ;;  %v1164_v39 = vmul.f32 %v1143_v43, %v2347_v12 }
 0xe98   :  { %v1161_v32 = vpop.permute.xlu2 %1160 }
 0xe99   :  { %v1163_v40 = vmul.f32 %v1161_v32, %v1158_v20 }
 0xe9b   :  { %v2387_v34 = vadd.f32 %v1164_v39, %v1163_v40 }
 0xe9d   :  { %1703 = vmatmul.msk.f32.vlgmr.msrb.gmra.mxu3 %vm150_vm5, %v2387_v34  ;;  %1717 = vmatmul.msk.f32.gmra.mxu0 %vm150_vm5, %v2387_v34 }
 0xeed   :  { %v1201_v53 = vpop.permute.xlu0 %1200 }
 0xeee   :  { %v1203_v55 = vmul.f32 %v1201_v53, %v1198_v52 }
 0xef0   :  { %v2394_v56 = vadd.f32 %v1204_v54, %v1203_v55 }
 0xef2   :  { %1207 = vrot.lane.b32.xlu1 %v2394_v56, %s1897_s29 }
 0xf20   :  { %v1271_v12 = vpop.f32.mrf.mxu3 }
 0xf21   :  { %v1321_v21 = vadd.f32 %v1271_v12, %v2074_v46  ;;  %1275 = vrot.lane.b32.xlu2 %v1271_v12, %s1897_s29 }
 0xf23   :  { %1323 = vrot.lane.b32.xlu0 %v1321_v21, %s1899_s15 }
 0xf64   :  { %v1208_v57 = vpop.permute.xlu1 %1207 }
 0xf65   :  { %1701 = vmatmul.msk.f32.vlgmr.msra.gmra.mxu1 %vm150_vm5, %v1208_v57  ;;  %1702 = vmatmul.msk.f32.vlgmr.msra.gmra.mxu2 %vm150_vm5, %v1208_v57 }
 0xf7b   :  { %v1276_v22 = vpop.permute.xlu2 %1275 }
 0xf95   :  { %v1324_v36 = vpop.permute.xlu0 %1323 }
 0xfe2   :  { %v1228_v17 = vpop.f32.mrf.mxu1 }
 0xfe3   :  { %v1278_v58 = vadd.f32 %v1276_v22, %v1228_v17  ;;  %v1361_v49 = vadd.f32 %v1228_v17, %v2091_v50  ;;  %v1341_v48 = vadd.f32 %v1228_v17, %v2072_v44 }
 0xfe5   :  { %v1280_v25 = vadd.f32 %v1278_v58, %v2091_v50  ;;  %1363 = vrot.lane.b32.xlu1 %v1361_v49, %s1896_s26  ;;  %v1706_v51 = vmul.f32 -1.442695, %v1341_v48 }
 0xfe7   :  { %v1704_v37 = vmul.f32 -1.442695, %v1280_v25 }
 0xfe8   :  { %v1248_v8 = vpop.f32.mrf.mxu2 }
 0xfe9   :  { %1841 = vpow2.f32 %v1704_v37  ;;  %v1320_v9 = vadd.f32 %v1248_v8, %v2091_v50  ;;  %v1279_v14 = vadd.f32 %v1276_v22, %v1248_v8 }
 0xfeb   :  { %v1281_v30 = vadd.f32 %v1279_v14, %v2091_v50 }
 0xfed   :  { %v1705_v15 = vmul.f32 -1.442695, %v1281_v30 }
 0xfef   :  { %v1842_v38 = vpop.eup %1841 }
 0xff0   :  { %v1288_v23 = vadd.f32 1.0, %v1842_v38 }
 0xff2   :  { %1843 = vrcp.f32 %v1288_v23  ;;  %v1301_v60 = vand.u32 2147483648, %v1288_v23  ;;  %v1299_v27 = vand.u32 2147483647, %v1288_v23  ;;  %vm1295_vm3 = vweird.f32 %v1288_v23 }
 0xff3   :  { %1845 = vpow2.f32 %v1706_v51 }
 0xff4   :  { %v1302_v35 = vor.u32 1.1754944e-38, %v1301_v60  ;;  %vm1300_vm6 = vcmp.eq.f32.partialorder %v1299_v27, 8.507059e+37  ;;  %v1543_v60 = vpop.f32.mrf.mxu0  ;;  %v1577_v27 = vld [vmem:[%s2514_s4 + $0x30] sm:$0xff] }
 0xff8   :  { %v1844_v24 = vpop.eup %1843 }
 0xff9   :  { %v1291_v28 = vmul.f32 %v1844_v24, %v1288_v23  ;;  %vm1296_vm2 = vweird.f32 %v1844_v24  ;;  %v1846_v59 = vpop.eup %1845 }
 0xffa   :  { %vm1297_vm4 = vmor %vm1295_vm3, %vm1296_vm2  ;;  %v1345_v61 = vadd.f32 1.0, %v1846_v59  ;;  %vm1644_vm3 = vcmask 48128  }
 0xffb   :  { %v1292_v33 = vsub.f32 1.0, %v1291_v28 }
 0xffc   :  { %1847 = vrcp.f32 %v1345_v61  ;;  %v1357_v3 = vand.u32 2147483648, %v1345_v61  ;;  %vm1351_vm8 = vweird.f32 %v1345_v61  ;;  %v1355_v4 = vand.u32 2147483647, %v1345_v61 }
 0xffd   :  { %v1293_v26 = vmul.f32 %v1844_v24, %v1292_v33  ;;  %v1895_v33 = vld [vmem:[%s2511_s5 + $0x1] ss:$0 sm:$0xff] }
 0xffe   :  { %v1358_v42 = vor.u32 1.1754944e-38, %v1357_v3  ;;  %vm1356_vm10 = vcmp.eq.f32.partialorder %v1355_v4, 8.507059e+37 }
 0xfff   :  { %v1294_v29 = vadd.f32 %v1844_v24, %v1293_v26 }
0x1001   :  { %v1298_v41 = vsel %vm1297_vm4, %v1844_v24, %v1294_v29  ;;  %v1576_v29 = vld [vmem:[%s2514_s4 + $0x28] sm:$0xff] }
0x1002   :  { %v1303_v45 = vsel %vm1300_vm6, %v1302_v35, %v1298_v41  ;;  %v1848_v62 = vpop.eup %1847  ;;  %v1546_v35 = vpop.f32.mrf.mxu0  ;;  %v1575_v41 = vld [vmem:[%s2514_s4 + $0x20] sm:$0xff] }
0x1003   :  { %v1326_v47 = vmul.f32 %v1324_v36, %v1303_v45  ;;  %v1347_v63 = vmul.f32 %v1848_v62, %v1345_v61  ;;  %vm1352_vm7 = vweird.f32 %v1848_v62 }
0x1004   :  { %vm1353_vm9 = vmor %vm1351_vm8, %vm1352_vm7 }
0x1005   :  { %1328 = vrot.lane.b32.xlu2 %v1326_v47, %s1896_s26  ;;  %v1348_v0 = vsub.f32 1.0, %v1347_v63 }
0x1007   :  { %v1349_v1 = vmul.f32 %v1848_v62, %v1348_v0 }
0x1009   :  { %v1350_v2 = vadd.f32 %v1848_v62, %v1349_v1 }
0x100a   :  { %v1549_v36 = vpop.f32.mrf.mxu0 }
0x100b   :  { %v1354_v5 = vsel %vm1353_vm9, %v1848_v62, %v1350_v2 }
0x100c   :  { %v1359_v6 = vsel %vm1356_vm10, %v1358_v42, %v1354_v5 }
0x100d   :  { %v1373_v25 = vsub.f32 1.0, %v1359_v6  ;;  %v1379_v38 = vmul.f32 %v1359_v6, %v2394_v56  ;;  %v1578_v56 = vld [vmem:[%s2514_s4 + $0x38] sm:$0xff] }
0x100e   :  { %1615 = vmatpush.msra.mxu1 %v1578_v56  ;;  %1729 = vmatpush.msra.mxu2 %v1578_v56 }
0x1010   :  { %1616 = vmatpush.msra.mxu1 %v1577_v27  ;;  %1730 = vmatpush.msra.mxu2 %v1577_v27 }
0x1012   :  { %1617 = vmatpush.msra.mxu1 %v1576_v29  ;;  %1731 = vmatpush.msra.mxu2 %v1576_v29  ;;  %v1552_v45 = vpop.f32.mrf.mxu0 }
0x1014   :  { %1618 = vmatpush.msra.mxu1 %v1575_v41  ;;  %1732 = vmatpush.msra.mxu2 %v1575_v41 }
0x101a   :  { %v1555_v48 = vpop.f32.mrf.mxu0 }
0x1022   :  { %v1558_v62 = vpop.f32.mrf.mxu0 }
0x1057   :  { %v1364_v11 = vpop.permute.xlu1 %1363 }
0x1058   :  { %v1366_v7 = vmul.f32 %v1364_v11, %v1359_v6 }
0x105a   :  { %1368 = vrot.lane.b32.xlu0 %v1366_v7, %s1896_s26 }
0x105f   :  { %v1329_v16 = vpop.permute.xlu2 %1328 }
0x1060   :  { %v1331_v10 = vadd.f32 %v1329_v16, %v1320_v9 }
0x1062   :  { %1849 = vtanh.f32 %v1331_v10 }
0x1063   :  { %1851 = vpow2.f32 %v1705_v15 }
0x1068   :  { %v1850_v13 = vpop.eup %1849 }
0x1069   :  { %1335 = vrot.lane.b32.xlu1 %v1850_v13, %s1897_s29  ;;  %v1852_v18 = vpop.eup %1851 }
0x106a   :  { %v1289_v19 = vadd.f32 1.0, %v1852_v18 }
0x106c   :  { %1853 = vrcp.f32 %v1289_v19  ;;  %v1316_v53 = vand.u32 2147483648, %v1289_v19  ;;  %vm1310_vm12 = vweird.f32 %v1289_v19  ;;  %v1314_v54 = vand.u32 2147483647, %v1289_v19 }
0x106e   :  { %v1317_v21 = vor.u32 1.1754944e-38, %v1316_v53  ;;  %vm1315_vm14 = vcmp.eq.f32.partialorder %v1314_v54, 8.507059e+37 }
0x1072   :  { %v1854_v31 = vpop.eup %1853 }
0x1073   :  { %v1306_v43 = vmul.f32 %v1854_v31, %v1289_v19  ;;  %vm1311_vm11 = vweird.f32 %v1854_v31 }
0x1074   :  { %vm1312_vm13 = vmor %vm1310_vm12, %vm1311_vm11 }
0x1075   :  { %v1307_v20 = vsub.f32 1.0, %v1306_v43 }
0x1077   :  { %v1308_v39 = vmul.f32 %v1854_v31, %v1307_v20 }
0x1079   :  { %v1309_v52 = vadd.f32 %v1854_v31, %v1308_v39 }
0x107b   :  { %v1313_v55 = vsel %vm1312_vm13, %v1854_v31, %v1309_v52 }
0x107c   :  { %v1318_v57 = vsel %vm1315_vm14, %v1317_v21, %v1313_v55 }
0x107d   :  { %v1333_v22 = vsub.f32 1.0, %v1318_v57  ;;  %v1339_v58 = vmul.f32 %v1318_v57, %v2387_v34 }
0x10cc   :  { %v1369_v32 = vpop.permute.xlu0 %1368 }
0x10cd   :  { %v1371_v40 = vadd.f32 %v1369_v32, %v2072_v44 }
0x10cf   :  { %1855 = vtanh.f32 %v1371_v40 }
0x10d5   :  { %v1856_v12 = vpop.eup %1855 }
0x10d6   :  { %1375 = vrot.lane.b32.xlu2 %v1856_v12, %s1897_s29 }
0x10db   :  { %v1336_v17 = vpop.permute.xlu1 %1335 }
0x10dc   :  { %v1338_v49 = vmul.f32 %v1336_v17, %v1333_v22 }
0x10de   :  { %v2415_v44 = vadd.f32 %v1339_v58, %v1338_v49 }
0x10e0   :  { %1709 = vmatmul.msk.f32.vlgmr.msra.gmra.mxu3 %vm150_vm5, %v2415_v44  ;;  %1718 = vmatmul.msk.f32.gmra.mxu0 %vm150_vm5, %v2415_v44 }
0x1130   :  { %v1376_v37 = vpop.permute.xlu2 %1375 }
0x1131   :  { %v1378_v23 = vmul.f32 %v1376_v37, %v1373_v25 }
0x1133   :  { %v1380_v24 = vadd.f32 %v1379_v38, %v1378_v23 }
0x1135   :  { %1382 = vrot.lane.b32.xlu0 %v1380_v24, %s1897_s29 }
0x115d   :  { %v1561_v3 = vpop.f32.mrf.mxu0 }
0x1163   :  { %v1446_v28 = vpop.f32.mrf.mxu3 }
0x1164   :  { %v1496_v34 = vadd.f32 %v1446_v28, %v2074_v46  ;;  %1450 = vrot.lane.b32.xlu1 %v1446_v28, %s1897_s29 }
0x1166   :  { %1498 = vrot.lane.b32.xlu2 %v1496_v34, %s1899_s15 }
0x116e   :  { %1520 = vrot.lane.b32.xlu2 %v1895_v33, %s1897_s29 }
0x11a7   :  { %v1383_v26 = vpop.permute.xlu0 %1382 }
0x11a8   :  { %1707 = vmatmul.msk.f32.vlgmr.msrb.gmra.mxu1 %vm150_vm5, %v1383_v26  ;;  %1708 = vmatmul.msk.f32.vlgmr.msrb.gmra.mxu2 %vm150_vm5, %v1383_v26 }
0x11c0   :  { %v1499_v47 = vpop.permute.xlu2 %1498 }
0x11c8   :  { %v2444_v51 = vpop.permute.xlu2 %1520 }
0x11c9   :  { %v1544_v59 = vadd.f32 %v1543_v60, %v2444_v51  ;;  %v1556_v61 = vadd.f32 %v1555_v48, %v2444_v51  ;;  %v1547_v63 = vadd.f32 %v1546_v35, %v2444_v51  ;;  %v1559_v0 = vadd.f32 %v1558_v62, %v2444_v51 }
0x11ca   :  { %v1550_v4 = vadd.f32 %v1549_v36, %v2444_v51  ;;  %v1562_v5 = vadd.f32 %v1561_v3, %v2444_v51  ;;  %v1553_v6 = vadd.f32 %v1552_v45, %v2444_v51 }
0x11cb   :  { %1857 = vtanh.f32 %v1544_v59 }
0x11cc   :  { %1859 = vtanh.f32 %v1556_v61 }
0x11cd   :  { %1861 = vtanh.f32 %v1547_v63 }
0x11ce   :  { %1863 = vtanh.f32 %v1559_v0 }
0x11cf   :  { %1865 = vtanh.f32 %v1550_v4 }
0x11d0   :  { %1867 = vtanh.f32 %v1562_v5 }
0x11d1   :  { %v1858_v1 = vpop.eup %1857  ;;  %1869 = vtanh.f32 %v1553_v6 }
0x11d2   :  { %v1860_v2 = vpop.eup %1859  ;;  %1720 = vmatmul.msk.f32.vlgmr.msra.gmra.mxu1 %vm150_vm5, %v1858_v1 }
0x11d3   :  { %1724 = vmatmul.msk.f32.vlgmr.msra.gmra.mxu2 %vm150_vm5, %v1860_v2  ;;  %v1862_v42 = vpop.eup %1861 }
0x11d4   :  { %v1864_v11 = vpop.eup %1863 }
0x11d5   :  { %v1866_v7 = vpop.eup %1865 }
0x11d6   :  { %v1868_v8 = vpop.eup %1867  ;;  %v1451_v16 = vpop.permute.xlu1 %1450 }
0x11d7   :  { %v1870_v9 = vpop.eup %1869 }
0x11da   :  { %1721 = vmatmul.msk.f32.gmra.mxu1 %vm150_vm5, %v1862_v42 }
0x11db   :  { %1725 = vmatmul.msk.f32.gmra.mxu2 %vm150_vm5, %v1864_v11 }
0x11e2   :  { %1722 = vmatmul.msk.f32.gmra.mxu1 %vm150_vm5, %v1866_v7 }
0x11e3   :  { %1726 = vmatmul.msk.f32.gmra.mxu2 %vm150_vm5, %v1868_v8 }
0x11ea   :  { %1723 = vmatmul.msk.f32.gmra.mxu1 %vm150_vm5, %v1870_v9 }
0x1225   :  { %v1403_v10 = vpop.f32.mrf.mxu1 }
0x1226   :  { %v1453_v13 = vadd.f32 %v1451_v16, %v1403_v10 }
0x1228   :  { %v1455_v14 = vadd.f32 %v1453_v13, %v2091_v50 }
0x122a   :  { %v1710_v30 = vmul.f32 -1.442695, %v1455_v14 }
0x122b   :  { %v1423_v12 = vpop.f32.mrf.mxu2 }
0x122c   :  { %1871 = vpow2.f32 %v1710_v30  ;;  %v1495_v60 = vadd.f32 %v1423_v12, %v2091_v50  ;;  %v1454_v29 = vadd.f32 %v1451_v16, %v1423_v12 }
0x122e   :  { %v1456_v35 = vadd.f32 %v1454_v29, %v2091_v50 }
0x1230   :  { %v1711_v41 = vmul.f32 -1.442695, %v1456_v35 }
0x1232   :  { %v1872_v15 = vpop.eup %1871 }
0x1233   :  { %v1463_v18 = vadd.f32 1.0, %v1872_v15 }
0x1235   :  { %1873 = vrcp.f32 %v1463_v18  ;;  %v1476_v20 = vand.u32 2147483648, %v1463_v18  ;;  %v1474_v39 = vand.u32 2147483647, %v1463_v18  ;;  %vm1470_vm0 = vweird.f32 %v1463_v18 }
0x1237   :  { %v1477_v52 = vor.u32 1.1754944e-38, %v1476_v20  ;;  %vm1475_vm2 = vcmp.eq.f32.partialorder %v1474_v39, 8.507059e+37 }
0x123b   :  { %v1874_v19 = vpop.eup %1873 }
0x123c   :  { %v1466_v31 = vmul.f32 %v1874_v19, %v1463_v18  ;;  %vm1471_vm15 = vweird.f32 %v1874_v19 }
0x123d   :  { %vm1472_vm1 = vmor %vm1470_vm0, %vm1471_vm15 }
0x123e   :  { %v1467_v43 = vsub.f32 1.0, %v1466_v31 }
0x1240   :  { %v1468_v32 = vmul.f32 %v1874_v19, %v1467_v43 }
0x1242   :  { %v1469_v40 = vadd.f32 %v1874_v19, %v1468_v32 }
0x1244   :  { %v1473_v53 = vsel %vm1472_vm1, %v1874_v19, %v1469_v40 }
0x1245   :  { %v1478_v54 = vsel %vm1475_vm2, %v1477_v52, %v1473_v53 }
0x1246   :  { %v1501_v55 = vmul.f32 %v1499_v47, %v1478_v54 }
0x1248   :  { %1503 = vrot.lane.b32.xlu0 %v1501_v55, %s1896_s26 }
0x124f   :  { %v1620_v21 = vpop.f32.mrf.mxu1 }
0x1250   :  { %v1621_v57 = vadd.f32 %v1620_v21, %v2074_v46 }
0x1252   :  { %1645 = vst.msk [vmem:[%s2515_s6] sm:$0xff] %vm1644_vm3, %v1621_v57 }
0x1256   :  { %v1632_v22 = vpop.f32.mrf.mxu2 }
0x1257   :  { %v1633_v17 = vadd.f32 %v1632_v22, %v2074_v46  ;;  %v1623_v58 = vpop.f32.mrf.mxu1 }
0x1258   :  { %v1624_v49 = vadd.f32 %v1623_v58, %v2074_v46 }
0x1259   :  { %1649 = vst.msk [vmem:[%s2515_s6 + $0x20] sm:$0xff] %vm1644_vm3, %v1633_v17 }
0x125a   :  { %1646 = vst.msk [vmem:[%s2515_s6 + $0x8] sm:$0xff] %vm1644_vm3, %v1624_v49 }
0x125e   :  { %v1635_v25 = vpop.f32.mrf.mxu2 }
0x125f   :  { %v1636_v37 = vadd.f32 %v1635_v25, %v2074_v46  ;;  %v1626_v38 = vpop.f32.mrf.mxu1 }
0x1260   :  { %v1627_v23 = vadd.f32 %v1626_v38, %v2074_v46 }
0x1261   :  { %1650 = vst.msk [vmem:[%s2515_s6 + $0x28] sm:$0xff] %vm1644_vm3, %v1636_v37 }
0x1262   :  { %1647 = vst.msk [vmem:[%s2515_s6 + $0x10] sm:$0xff] %vm1644_vm3, %v1627_v23 }
0x1266   :  { %v1638_v24 = vpop.f32.mrf.mxu2 }
0x1267   :  { %v1639_v28 = vadd.f32 %v1638_v24, %v2074_v46  ;;  %v1629_v34 = vpop.f32.mrf.mxu1 }
0x1268   :  { %v1630_v33 = vadd.f32 %v1629_v34, %v2074_v46 }
0x1269   :  { %1651 = vst.msk [vmem:[%s2515_s6 + $0x30] sm:$0xff] %vm1644_vm3, %v1639_v28 }
0x126a   :  { %1648 = vst.msk [vmem:[%s2515_s6 + $0x18] sm:$0xff] %vm1644_vm3, %v1630_v33 }
0x12ba   :  { %v1504_v26 = vpop.permute.xlu0 %1503 }
0x12bb   :  { %v1506_v56 = vadd.f32 %v1504_v26, %v1495_v60 }
0x12bd   :  { %1875 = vtanh.f32 %v1506_v56 }
0x12be   :  { %1877 = vpow2.f32 %v1711_v41 }
0x12c3   :  { %v1876_v27 = vpop.eup %1875 }
0x12c4   :  { %1510 = vrot.lane.b32.xlu1 %v1876_v27, %s1897_s29  ;;  %v1878_v36 = vpop.eup %1877 }
0x12c5   :  { %v1464_v45 = vadd.f32 1.0, %v1878_v36 }
0x12c7   :  { %1879 = vrcp.f32 %v1464_v45  ;;  %v1491_v63 = vand.u32 2147483648, %v1464_v45  ;;  %vm1485_vm6 = vweird.f32 %v1464_v45  ;;  %v1489_v0 = vand.u32 2147483647, %v1464_v45 }
0x12c9   :  { %v1492_v2 = vor.u32 1.1754944e-38, %v1491_v63  ;;  %vm1490_vm8 = vcmp.eq.f32.partialorder %v1489_v0, 8.507059e+37 }
0x12cd   :  { %v1880_v47 = vpop.eup %1879 }
0x12ce   :  { %v1481_v48 = vmul.f32 %v1880_v47, %v1464_v45  ;;  %vm1486_vm4 = vweird.f32 %v1880_v47 }
0x12cf   :  { %vm1487_vm7 = vmor %vm1485_vm6, %vm1486_vm4 }
0x12d0   :  { %v1482_v59 = vsub.f32 1.0, %v1481_v48 }
0x12d2   :  { %v1483_v61 = vmul.f32 %v1880_v47, %v1482_v59 }
0x12d4   :  { %v1484_v62 = vadd.f32 %v1880_v47, %v1483_v61 }
0x12d6   :  { %v1488_v1 = vsel %vm1487_vm7, %v1880_v47, %v1484_v62 }
0x12d7   :  { %v1493_v3 = vsel %vm1490_vm8, %v1492_v2, %v1488_v1 }
0x12d8   :  { %v1508_v50 = vsub.f32 1.0, %v1493_v3  ;;  %v1514_v5 = vmul.f32 %v1493_v3, %v2415_v44 }
0x1336   :  { %v1511_v4 = vpop.permute.xlu1 %1510 }
0x1337   :  { %v1513_v42 = vmul.f32 %v1511_v4, %v1508_v50 }
0x1339   :  { %v1515_v11 = vadd.f32 %v1514_v5, %v1513_v42 }
0x133b   :  { %1719 = vmatmul.msk.f32.gmra.mxu0 %vm150_vm5, %v1515_v11 }
0x13b8   :  { %v1564_v6 = vpop.f32.mrf.mxu0 }
0x13b9   :  { %v1565_v7 = vadd.f32 %v1564_v6, %v2444_v51 }
0x13bb   :  { %1881 = vtanh.f32 %v1565_v7 }
0x13c1   :  { %v1882_v8 = vpop.eup %1881 }
0x13c2   :  { %1727 = vmatmul.msk.f32.gmra.mxu2 %vm150_vm5, %v1882_v8 }
0x1445   :  { %v1641_v9 = vpop.f32.mrf.mxu2 }
0x1446   :  { %v1642_v16 = vadd.f32 %v1641_v9, %v2074_v46 }
0x1448   :  { %1652 = vst.msk [vmem:[%s2515_s6 + $0x38] sm:$0xff] %vm1644_vm3, %v1642_v16 }

</bundles_post_ra>
